<compile_context>
chip_gen: v6e
topology: v6e:2x2x1
jax: 0.10.0
libtpu: 0.0.40
codegen_flags: <defaults>
</compile_context>

<pallas_src>
import jax
import jax.numpy as jnp
from jax.experimental import pallas as pl
from jax.experimental.pallas import tpu as pltpu

INPUT_DIM = 8
HIDDEN_DIM = 32
OUTPUT_DIM = 4      # decoder exists in the torch module but is unused in forward()
N_LAYERS = 2
N_NODES = 32
K_CHEB = 5


# ---------------------------------------------------------------------------
# Fused Pallas kernel: whole forward (all layers) in a single pallas_call
# ---------------------------------------------------------------------------
def make_model_kernel(n_layers, k_cheb, ch):
    def kernel(L_ref, x_ref, h0_ref, w_all_ref, w_hh_ref, b_all_ref, hout_ref):
        L = L_ref[...]                       # (N, N) scaled Laplacian
        L2 = 2.0 * L                         # hoisted once: T_k = L2 @ T_{k-1} - T_{k-2}

        def cheb_accumulate(feat, w_at):
            # sum_k T_k(L_hat, feat) @ W_k with per-hop accumulation (no lane concat).
            t_prev = feat
            out = jnp.dot(t_prev, w_at(0), preferred_element_type=jnp.float32)
            if k_cheb > 1:
                t_cur = jnp.dot(L, t_prev, preferred_element_type=jnp.float32)
                out = out + jnp.dot(t_cur, w_at(1), preferred_element_type=jnp.float32)
                for k in range(2, k_cheb):
                    t_next = (jnp.dot(L2, t_cur, preferred_element_type=jnp.float32)
                              - t_prev)
                    out = out + jnp.dot(t_next, w_at(k),
                                        preferred_element_type=jnp.float32)
                    t_prev, t_cur = t_cur, t_next
            return out

        cur = x_ref[...]                     # (N, Ch) node features (zero-padded to Ch)
        for layer in range(n_layers):
            h = h0_ref[layer]                                        # (N, Ch)
            xh = jnp.concatenate([cur, h], axis=-1)                  # (N, 2*Ch), once
            gates = (cheb_accumulate(xh, lambda k, l=layer: w_all_ref[l, k])
                     + b_all_ref[layer])                             # (N, 128) lane-dense
            zr = jax.nn.sigmoid(gates[:, :2 * ch])                   # one 64-wide sigmoid
            z = zr[:, :ch]
            r = zr[:, ch:2 * ch]
            cand_x = gates[:, 2 * ch:3 * ch]       # x-path of candidate (+ folded biases)
            hh = cheb_accumulate(h * r, lambda k, l=layer: w_hh_ref[l, k])
            h_tilde = jnp.tanh(cand_x + hh)
            h_new = z * h + (1.0 - z) * h_tilde
            # F.relu then F.dropout(p=0.5, training=False) -> identity in eval mode.
            cur = jnp.maximum(h_new, 0.0)
            hout_ref[layer] = cur

    return kernel


def _fused_forward(L_hat, w_all, w_hh, b_all, node_embedding, h0_stack):
    n_layers, n_nodes, ch = h0_stack.shape
    k_cheb = w_all.shape[1]
    cin = node_embedding.shape[-1]
    x_pad = (jnp.pad(node_embedding, ((0, 0), (0, ch - cin)))
             if cin < ch else node_embedding)                        # (N, Ch)
    return pl.pallas_call(
        make_model_kernel(n_layers, k_cheb, ch),
        out_shape=jax.ShapeDtypeStruct((n_layers, n_nodes, ch), jnp.float32),
        in_specs=[pl.BlockSpec(memory_space=pltpu.MemorySpace.VMEM)] * 6,
        out_specs=pl.BlockSpec(memory_space=pltpu.MemorySpace.VMEM),
    )(L_hat, x_pad, h0_stack, w_all, w_hh, b_all)


_fused_forward_jit = jax.jit(_fused_forward)


# ---------------------------------------------------------------------------
# Plain-JAX glue: Laplacian, parameter init / prepacking (hoisted, once per model)
# ---------------------------------------------------------------------------
def build_scaled_laplacian(edge_index, edge_weight, n_nodes):
    """PyG ChebConv('sym', lambda_max=2):  L_hat = -D^{-1/2} A D^{-1/2}."""
    src, dst = edge_index
    A = jnp.zeros((n_nodes, n_nodes), jnp.float32).at[dst, src].add(edge_weight)
    deg = jnp.sum(A, axis=1)
    dinv_sqrt = jnp.where(deg > 0, 1.0 / jnp.sqrt(jnp.maximum(deg, 1e-12)), 0.0)
    return -(dinv_sqrt[:, None] * A * dinv_sqrt[None, :])


def glorot(key, shape):
    fan_in, fan_out = shape[-2], shape[-1]
    limit = (6.0 / (fan_in + fan_out)) ** 0.5
    return jax.random.uniform(key, shape, jnp.float32, -limit, limit)


def init_layer_params(key, cin, ch, k_cheb):
    keys = jax.random.split(key, 6)
    wxz = glorot(keys[0], (k_cheb, cin, ch))
    whz = glorot(keys[1], (k_cheb, ch, ch))
    wxr = glorot(keys[2], (k_cheb, cin, ch))
    whr = glorot(keys[3], (k_cheb, ch, ch))
    wxh = glorot(keys[4], (k_cheb, cin, ch))
    whh = glorot(keys[5], (k_cheb, ch, ch))
    zb = jnp.zeros((1, ch), jnp.float32)             # ChebConv bias init = zeros
    return (wxz, whz, wxr, whr, wxh, whh, zb, zb, zb, zb, zb, zb)


def pack_layer_params(wxz, whz, wxr, whr, wxh, whh,
                      bxz, bhz, bxr, bhr, bxh, bhh, *, ch_pad):
    """Pack 6 ChebConv weight stacks + 6 biases into (w_all, w_hh, b_all).

    w_all[k] row blocks are [x rows (zero-padded Cin->ch_pad) ; h rows], matching the
    in-kernel joint feature [x_pad | h]; its columns are [z | r | cand | 0-pad] padded
    to a 128-lane multiple.  The candidate gate only takes the x path here (its h-rows
    are zero); the h*r path is the separate (K, Ch, Ch) stack w_hh.
    """
    k, cin, ch = wxz.shape
    gw = -(-3 * ch // 128) * 128                                         # lane-dense width
    x_rows = jnp.concatenate([wxz, wxr, wxh], axis=-1)                   # (K, Cin, 3*Ch)
    x_rows = jnp.pad(x_rows, ((0, 0), (0, ch_pad - cin), (0, 0)))        # Cin -> ch_pad
    h_rows = jnp.concatenate([whz, whr, jnp.zeros_like(whz)], axis=-1)   # (K, Ch, 3*Ch)
    w_all = jnp.concatenate([x_rows, h_rows], axis=1)                    # (K, ch_pad+Ch, 3*Ch)
    w_all = jnp.pad(w_all, ((0, 0), (0, 0), (0, gw - 3 * ch)))           # -> (K, ., gw)
    b_all = jnp.concatenate([bxz + bhz, bxr + bhr, bxh + bhh], axis=-1)  # (1, 3*Ch)
    b_all = jnp.pad(b_all, ((0, 0), (0, gw - 3 * ch)))                   # (1, gw)
    return w_all, whh, b_all


def prepare_gconv_gru(edge_index, edge_weight, layer_params, n_nodes):
    """Step-invariant work, done ONCE per model: Laplacian + weight prepacking."""
    L_hat = build_scaled_laplacian(edge_index, edge_weight, n_nodes)
    ch = layer_params[0][1].shape[-1]
    assert layer_params[0][0].shape[1] <= ch, "input_dim must be <= hidden_dim for padding"
    packed = [pack_layer_params(*p, ch_pad=ch) for p in layer_params]
    w_all = jnp.stack([p[0] for p in packed])     # (L, K, 2*Ch, 128)
    w_hh = jnp.stack([p[1] for p in packed])      # (L, K, Ch, Ch)
    b_all = jnp.stack([p[2] for p in packed])     # (L, 1, 128)
    return L_hat, w_all, w_hh, b_all


def gconv_gru_model_forward(prepared, node_embedding, h0=None):
    """Mirrors GConvGRUModel.forward: returns (out, hidden_states, [])."""
    L_hat, w_all, w_hh, b_all = prepared
    n_layers = w_all.shape[0]
    ch = w_hh.shape[-1]
    n_nodes = node_embedding.shape[0]
    if h0 is None:                                   # torch init__hidd -> ones
        h0_stack = jnp.ones((n_layers, n_nodes, ch), jnp.float32)
    else:
        h0_stack = jnp.stack(h0)
    hidden = _fused_forward_jit(L_hat, w_all, w_hh, b_all, node_embedding, h0_stack)
    new_hidden_states = [hidden[layer] for layer in range(n_layers)]
    out = new_hidden_states[-1]
    return out, new_hidden_states, []


# ---------------------------------------------------------------------------
# Pure-JAX reference (unpacked, per-gate ChebConvs) for correctness checking
# ---------------------------------------------------------------------------
def _cheb_conv_ref(L, feat, w, b):
    hp = jax.lax.Precision.HIGHEST
    tx0 = feat
    out = jnp.dot(tx0, w[0], precision=hp)
    tx1 = jnp.dot(L, tx0, precision=hp)
    out = out + jnp.dot(tx1, w[1], precision=hp)
    for k in range(2, w.shape[0]):
        tx2 = 2.0 * jnp.dot(L, tx1, precision=hp) - tx0
        out = out + jnp.dot(tx2, w[k], precision=hp)
        tx0, tx1 = tx1, tx2
    return out + b


def gconv_gru_model_reference(edge_index, edge_weight, node_embedding,
                              layer_params, h0=None):
    n_layers = len(layer_params)
    n_nodes = node_embedding.shape[0]
    hidden_dim = layer_params[0][1].shape[-1]
    if h0 is None:
        h0 = [jnp.ones((n_nodes, hidden_dim), jnp.float32) for _ in range(n_layers)]
    L = build_scaled_laplacian(edge_index, edge_weight, n_nodes)
    cur, hs = node_embedding, []
    for layer in range(n_layers):
        wxz, whz, wxr, whr, wxh, whh, bxz, bhz, bxr, bhr, bxh, bhh = layer_params[layer]
        h = h0[layer]
        z = jax.nn.sigmoid(_cheb_conv_ref(L, cur, wxz, bxz) + _cheb_conv_ref(L, h, whz, bhz))
        r = jax.nn.sigmoid(_cheb_conv_ref(L, cur, wxr, bxr) + _cheb_conv_ref(L, h, whr, bhr))
        h_tilde = jnp.tanh(_cheb_conv_ref(L, cur, wxh, bxh)
                           + _cheb_conv_ref(L, h * r, whh, bhh))
        h_new = jnp.maximum(z * h + (1.0 - z) * h_tilde, 0.0)
        hs.append(h_new)
        cur = h_new
    return hs[-1], hs, []


if __name__ == "__main__":
    root = jax.random.PRNGKey(0)
    k_emb, k_w, k_param = jax.random.split(root, 3)

    # Node embedding: nn.Embedding(n_nodes, input_dim), uniform(-1, 1).
    node_embedding = jax.random.uniform(
        k_emb, (N_NODES, INPUT_DIM), jnp.float32, -1.0, 1.0)

    # Deterministic symmetric graph: ring i <-> (i+1) mod N with positive weights.
    i = jnp.arange(N_NODES, dtype=jnp.int32)
    j = (i + 1) % N_NODES
    src = jnp.concatenate([i, j])
    dst = jnp.concatenate([j, i])
    edge_index = jnp.stack([src, dst])                       # (2, 2*N_NODES)
    w_half = jax.random.uniform(k_w, (N_NODES,), jnp.float32, 0.5, 1.5)
    edge_weight = jnp.concatenate([w_half, w_half])          # symmetric weights

    # Per-layer GConvGRU parameters (layer 0: input_dim -> hidden, rest hidden -> hidden).
    layer_keys = jax.random.split(k_param, N_LAYERS)
    layer_params = [
        init_layer_params(layer_keys[l],
                          INPUT_DIM if l == 0 else HIDDEN_DIM,
                          HIDDEN_DIM, K_CHEB)
        for l in range(N_LAYERS)
    ]

    # Hoisted (step-invariant) work: Laplacian + weight prepacking, done once.
    prepared = prepare_gconv_gru(edge_index, edge_weight, layer_params, N_NODES)
    prepared = jax.block_until_ready(prepared)

    # Per-step forward: one jitted call wrapping a single fused pallas_call.
    out, hidden_states, extras = gconv_gru_model_forward(prepared, node_embedding, h0=None)
    out = jax.block_until_ready(out)

    assert out.shape == (N_NODES, HIDDEN_DIM)
    assert len(hidden_states) == N_LAYERS
    assert extras == []

    # Correctness check against the unpacked pure-JAX reference.
    out_ref, hidden_ref, _ = gconv_gru_model_reference(
        edge_index, edge_weight, node_embedding, layer_params, h0=None)
    for h_k, h_r in zip(hidden_states, hidden_ref):
        assert jnp.allclose(h_k, h_r, atol=1e-3, rtol=1e-3)
    assert jnp.allclose(out, out_ref, atol=1e-3, rtol=1e-3)

    print("KERNEL_OK")
</pallas_src>

<mosaic_0001>
module attributes {stable_mosaic.version = 11 : i64} {
  func.func @kernel(%arg0: memref<32x32xf32, #tpu.memory_space<vmem>>, %arg1: memref<32x32xf32, #tpu.memory_space<vmem>>, %arg2: memref<2x32x32xf32, #tpu.memory_space<vmem>>, %arg3: memref<2x5x64x128xf32, #tpu.memory_space<vmem>>, %arg4: memref<2x5x32x32xf32, #tpu.memory_space<vmem>>, %arg5: memref<2x1x128xf32, #tpu.memory_space<vmem>>, %arg6: memref<2x32x32xf32, #tpu.memory_space<vmem>>) attributes {dimension_semantics = [], scalar_prefetch = 0 : i64, scratch_operands = 0 : i64, tpu.core_type = #tpu.core_type<tc>} {
    %c0 = arith.constant 0 : index
    %c0_0 = arith.constant 0 : index
    %0 = vector.load %arg0[%c0, %c0_0] : memref<32x32xf32, #tpu.memory_space<vmem>>, vector<32x32xf32>
    %cst = arith.constant 2.000000e+00 : f32
    %1 = vector.broadcast %cst : f32 to vector<32x32xf32>
    %2 = arith.mulf %1, %0 : vector<32x32xf32>
    %c0_1 = arith.constant 0 : index
    %c0_2 = arith.constant 0 : index
    %3 = vector.load %arg1[%c0_1, %c0_2] : memref<32x32xf32, #tpu.memory_space<vmem>>, vector<32x32xf32>
    %c0_3 = arith.constant 0 : index
    %c0_4 = arith.constant 0 : index
    %c0_5 = arith.constant 0 : index
    %4 = vector.load %arg2[%c0_3, %c0_4, %c0_5] : memref<2x32x32xf32, #tpu.memory_space<vmem>>, vector<1x32x32xf32>
    %5 = vector.shape_cast %4 : vector<1x32x32xf32> to vector<32x32xf32>
    %6 = tpu.concatenate %3, %5 in 1 : vector<32x32xf32>, vector<32x32xf32> -> vector<32x64xf32>
    %c0_6 = arith.constant 0 : index
    %c0_7 = arith.constant 0 : index
    %c0_8 = arith.constant 0 : index
    %c0_9 = arith.constant 0 : index
    %7 = vector.load %arg3[%c0_6, %c0_7, %c0_8, %c0_9] : memref<2x5x64x128xf32, #tpu.memory_space<vmem>>, vector<1x1x64x128xf32>
    %8 = vector.shape_cast %7 : vector<1x1x64x128xf32> to vector<64x128xf32>
    %cst_10 = arith.constant dense<0.000000e+00> : vector<32x128xf32>
    %9 = tpu.matmul %6, %8, %cst_10 {dimension_numbers = #tpu.dot_dimension_numbers<[1], [0], [0], [1], [0, 0, 1, 1], [], []>} : vector<32x64xf32>, vector<64x128xf32>, vector<32x128xf32> -> vector<32x128xf32>
    %cst_11 = arith.constant dense<0.000000e+00> : vector<32x64xf32>
    %10 = tpu.matmul %0, %6, %cst_11 {dimension_numbers = #tpu.dot_dimension_numbers<[1], [0], [0], [1], [0, 0, 1, 1], [], []>} : vector<32x32xf32>, vector<32x64xf32>, vector<32x64xf32> -> vector<32x64xf32>
    %c0_12 = arith.constant 0 : index
    %c1 = arith.constant 1 : index
    %c0_13 = arith.constant 0 : index
    %c0_14 = arith.constant 0 : index
    %11 = vector.load %arg3[%c0_12, %c1, %c0_13, %c0_14] : memref<2x5x64x128xf32, #tpu.memory_space<vmem>>, vector<1x1x64x128xf32>
    %12 = vector.shape_cast %11 : vector<1x1x64x128xf32> to vector<64x128xf32>
    %cst_15 = arith.constant dense<0.000000e+00> : vector<32x128xf32>
    %13 = tpu.matmul %10, %12, %cst_15 {dimension_numbers = #tpu.dot_dimension_numbers<[1], [0], [0], [1], [0, 0, 1, 1], [], []>} : vector<32x64xf32>, vector<64x128xf32>, vector<32x128xf32> -> vector<32x128xf32>
    %14 = arith.addf %9, %13 : vector<32x128xf32>
    %cst_16 = arith.constant dense<0.000000e+00> : vector<32x64xf32>
    %15 = tpu.matmul %2, %10, %cst_16 {dimension_numbers = #tpu.dot_dimension_numbers<[1], [0], [0], [1], [0, 0, 1, 1], [], []>} : vector<32x32xf32>, vector<32x64xf32>, vector<32x64xf32> -> vector<32x64xf32>
    %16 = arith.subf %15, %6 : vector<32x64xf32>
    %c0_17 = arith.constant 0 : index
    %c2 = arith.constant 2 : index
    %c0_18 = arith.constant 0 : index
    %c0_19 = arith.constant 0 : index
    %17 = vector.load %arg3[%c0_17, %c2, %c0_18, %c0_19] : memref<2x5x64x128xf32, #tpu.memory_space<vmem>>, vector<1x1x64x128xf32>
    %18 = vector.shape_cast %17 : vector<1x1x64x128xf32> to vector<64x128xf32>
    %cst_20 = arith.constant dense<0.000000e+00> : vector<32x128xf32>
    %19 = tpu.matmul %16, %18, %cst_20 {dimension_numbers = #tpu.dot_dimension_numbers<[1], [0], [0], [1], [0, 0, 1, 1], [], []>} : vector<32x64xf32>, vector<64x128xf32>, vector<32x128xf32> -> vector<32x128xf32>
    %20 = arith.addf %14, %19 : vector<32x128xf32>
    %cst_21 = arith.constant dense<0.000000e+00> : vector<32x64xf32>
    %21 = tpu.matmul %2, %16, %cst_21 {dimension_numbers = #tpu.dot_dimension_numbers<[1], [0], [0], [1], [0, 0, 1, 1], [], []>} : vector<32x32xf32>, vector<32x64xf32>, vector<32x64xf32> -> vector<32x64xf32>
    %22 = arith.subf %21, %10 : vector<32x64xf32>
    %c0_22 = arith.constant 0 : index
    %c3 = arith.constant 3 : index
    %c0_23 = arith.constant 0 : index
    %c0_24 = arith.constant 0 : index
    %23 = vector.load %arg3[%c0_22, %c3, %c0_23, %c0_24] : memref<2x5x64x128xf32, #tpu.memory_space<vmem>>, vector<1x1x64x128xf32>
    %24 = vector.shape_cast %23 : vector<1x1x64x128xf32> to vector<64x128xf32>
    %cst_25 = arith.constant dense<0.000000e+00> : vector<32x128xf32>
    %25 = tpu.matmul %22, %24, %cst_25 {dimension_numbers = #tpu.dot_dimension_numbers<[1], [0], [0], [1], [0, 0, 1, 1], [], []>} : vector<32x64xf32>, vector<64x128xf32>, vector<32x128xf32> -> vector<32x128xf32>
    %26 = arith.addf %20, %25 : vector<32x128xf32>
    %cst_26 = arith.constant dense<0.000000e+00> : vector<32x64xf32>
    %27 = tpu.matmul %2, %22, %cst_26 {dimension_numbers = #tpu.dot_dimension_numbers<[1], [0], [0], [1], [0, 0, 1, 1], [], []>} : vector<32x32xf32>, vector<32x64xf32>, vector<32x64xf32> -> vector<32x64xf32>
    %28 = arith.subf %27, %16 : vector<32x64xf32>
    %c0_27 = arith.constant 0 : index
    %c4 = arith.constant 4 : index
    %c0_28 = arith.constant 0 : index
    %c0_29 = arith.constant 0 : index
    %29 = vector.load %arg3[%c0_27, %c4, %c0_28, %c0_29] : memref<2x5x64x128xf32, #tpu.memory_space<vmem>>, vector<1x1x64x128xf32>
    %30 = vector.shape_cast %29 : vector<1x1x64x128xf32> to vector<64x128xf32>
    %cst_30 = arith.constant dense<0.000000e+00> : vector<32x128xf32>
    %31 = tpu.matmul %28, %30, %cst_30 {dimension_numbers = #tpu.dot_dimension_numbers<[1], [0], [0], [1], [0, 0, 1, 1], [], []>} : vector<32x64xf32>, vector<64x128xf32>, vector<32x128xf32> -> vector<32x128xf32>
    %32 = arith.addf %26, %31 : vector<32x128xf32>
    %c0_31 = arith.constant 0 : index
    %c0_32 = arith.constant 0 : index
    %c0_33 = arith.constant 0 : index
    %33 = vector.load %arg5[%c0_31, %c0_32, %c0_33] : memref<2x1x128xf32, #tpu.memory_space<vmem>>, vector<1x1x128xf32>
    %34 = vector.shape_cast %33 : vector<1x1x128xf32> to vector<1x128xf32>
    %35 = vector.broadcast %34 : vector<1x128xf32> to vector<32x128xf32>
    %36 = arith.addf %32, %35 : vector<32x128xf32>
    %37 = vector.extract_strided_slice %36 {offsets = [0, 0], sizes = [32, 64], strides = [1, 1]} : vector<32x128xf32> to vector<32x64xf32>
    %38 = arith.negf %37 : vector<32x64xf32>
    %39 = math.exp %38 : vector<32x64xf32>
    %cst_34 = arith.constant 1.000000e+00 : f32
    %40 = vector.broadcast %cst_34 : f32 to vector<32x64xf32>
    %41 = arith.addf %40, %39 : vector<32x64xf32>
    %42 = arith.divf %40, %41 : vector<32x64xf32>
    %43 = vector.extract_strided_slice %42 {offsets = [0, 0], sizes = [32, 32], strides = [1, 1]} : vector<32x64xf32> to vector<32x32xf32>
    %44 = vector.extract_strided_slice %42 {offsets = [0, 32], sizes = [32, 32], strides = [1, 1]} : vector<32x64xf32> to vector<32x32xf32>
    %45 = vector.extract_strided_slice %36 {offsets = [0, 64], sizes = [32, 32], strides = [1, 1]} : vector<32x128xf32> to vector<32x32xf32>
    %46 = arith.mulf %5, %44 : vector<32x32xf32>
    %c0_35 = arith.constant 0 : index
    %c0_36 = arith.constant 0 : index
    %c0_37 = arith.constant 0 : index
    %c0_38 = arith.constant 0 : index
    %47 = vector.load %arg4[%c0_35, %c0_36, %c0_37, %c0_38] : memref<2x5x32x32xf32, #tpu.memory_space<vmem>>, vector<1x1x32x32xf32>
    %48 = vector.shape_cast %47 : vector<1x1x32x32xf32> to vector<32x32xf32>
    %cst_39 = arith.constant dense<0.000000e+00> : vector<32x32xf32>
    %49 = tpu.matmul %46, %48, %cst_39 {dimension_numbers = #tpu.dot_dimension_numbers<[1], [0], [0], [1], [0, 0, 1, 1], [], []>} : vector<32x32xf32>, vector<32x32xf32>, vector<32x32xf32> -> vector<32x32xf32>
    %cst_40 = arith.constant dense<0.000000e+00> : vector<32x32xf32>
    %50 = tpu.matmul %0, %46, %cst_40 {dimension_numbers = #tpu.dot_dimension_numbers<[1], [0], [0], [1], [0, 0, 1, 1], [], []>} : vector<32x32xf32>, vector<32x32xf32>, vector<32x32xf32> -> vector<32x32xf32>
    %c0_41 = arith.constant 0 : index
    %c1_42 = arith.constant 1 : index
    %c0_43 = arith.constant 0 : index
    %c0_44 = arith.constant 0 : index
    %51 = vector.load %arg4[%c0_41, %c1_42, %c0_43, %c0_44] : memref<2x5x32x32xf32, #tpu.memory_space<vmem>>, vector<1x1x32x32xf32>
    %52 = vector.shape_cast %51 : vector<1x1x32x32xf32> to vector<32x32xf32>
    %cst_45 = arith.constant dense<0.000000e+00> : vector<32x32xf32>
    %53 = tpu.matmul %50, %52, %cst_45 {dimension_numbers = #tpu.dot_dimension_numbers<[1], [0], [0], [1], [0, 0, 1, 1], [], []>} : vector<32x32xf32>, vector<32x32xf32>, vector<32x32xf32> -> vector<32x32xf32>
    %54 = arith.addf %49, %53 : vector<32x32xf32>
    %cst_46 = arith.constant dense<0.000000e+00> : vector<32x32xf32>
    %55 = tpu.matmul %2, %50, %cst_46 {dimension_numbers = #tpu.dot_dimension_numbers<[1], [0], [0], [1], [0, 0, 1, 1], [], []>} : vector<32x32xf32>, vector<32x32xf32>, vector<32x32xf32> -> vector<32x32xf32>
    %56 = arith.subf %55, %46 : vector<32x32xf32>
    %c0_47 = arith.constant 0 : index
    %c2_48 = arith.constant 2 : index
    %c0_49 = arith.constant 0 : index
    %c0_50 = arith.constant 0 : index
    %57 = vector.load %arg4[%c0_47, %c2_48, %c0_49, %c0_50] : memref<2x5x32x32xf32, #tpu.memory_space<vmem>>, vector<1x1x32x32xf32>
    %58 = vector.shape_cast %57 : vector<1x1x32x32xf32> to vector<32x32xf32>
    %cst_51 = arith.constant dense<0.000000e+00> : vector<32x32xf32>
    %59 = tpu.matmul %56, %58, %cst_51 {dimension_numbers = #tpu.dot_dimension_numbers<[1], [0], [0], [1], [0, 0, 1, 1], [], []>} : vector<32x32xf32>, vector<32x32xf32>, vector<32x32xf32> -> vector<32x32xf32>
    %60 = arith.addf %54, %59 : vector<32x32xf32>
    %cst_52 = arith.constant dense<0.000000e+00> : vector<32x32xf32>
    %61 = tpu.matmul %2, %56, %cst_52 {dimension_numbers = #tpu.dot_dimension_numbers<[1], [0], [0], [1], [0, 0, 1, 1], [], []>} : vector<32x32xf32>, vector<32x32xf32>, vector<32x32xf32> -> vector<32x32xf32>
    %62 = arith.subf %61, %50 : vector<32x32xf32>
    %c0_53 = arith.constant 0 : index
    %c3_54 = arith.constant 3 : index
    %c0_55 = arith.constant 0 : index
    %c0_56 = arith.constant 0 : index
    %63 = vector.load %arg4[%c0_53, %c3_54, %c0_55, %c0_56] : memref<2x5x32x32xf32, #tpu.memory_space<vmem>>, vector<1x1x32x32xf32>
    %64 = vector.shape_cast %63 : vector<1x1x32x32xf32> to vector<32x32xf32>
    %cst_57 = arith.constant dense<0.000000e+00> : vector<32x32xf32>
    %65 = tpu.matmul %62, %64, %cst_57 {dimension_numbers = #tpu.dot_dimension_numbers<[1], [0], [0], [1], [0, 0, 1, 1], [], []>} : vector<32x32xf32>, vector<32x32xf32>, vector<32x32xf32> -> vector<32x32xf32>
    %66 = arith.addf %60, %65 : vector<32x32xf32>
    %cst_58 = arith.constant dense<0.000000e+00> : vector<32x32xf32>
    %67 = tpu.matmul %2, %62, %cst_58 {dimension_numbers = #tpu.dot_dimension_numbers<[1], [0], [0], [1], [0, 0, 1, 1], [], []>} : vector<32x32xf32>, vector<32x32xf32>, vector<32x32xf32> -> vector<32x32xf32>
    %68 = arith.subf %67, %56 : vector<32x32xf32>
    %c0_59 = arith.constant 0 : index
    %c4_60 = arith.constant 4 : index
    %c0_61 = arith.constant 0 : index
    %c0_62 = arith.constant 0 : index
    %69 = vector.load %arg4[%c0_59, %c4_60, %c0_61, %c0_62] : memref<2x5x32x32xf32, #tpu.memory_space<vmem>>, vector<1x1x32x32xf32>
    %70 = vector.shape_cast %69 : vector<1x1x32x32xf32> to vector<32x32xf32>
    %cst_63 = arith.constant dense<0.000000e+00> : vector<32x32xf32>
    %71 = tpu.matmul %68, %70, %cst_63 {dimension_numbers = #tpu.dot_dimension_numbers<[1], [0], [0], [1], [0, 0, 1, 1], [], []>} : vector<32x32xf32>, vector<32x32xf32>, vector<32x32xf32> -> vector<32x32xf32>
    %72 = arith.addf %66, %71 : vector<32x32xf32>
    %73 = arith.addf %45, %72 : vector<32x32xf32>
    %74 = math.tanh %73 : vector<32x32xf32>
    %75 = arith.mulf %43, %5 : vector<32x32xf32>
    %cst_64 = arith.constant 1.000000e+00 : f32
    %76 = vector.broadcast %cst_64 : f32 to vector<32x32xf32>
    %77 = arith.subf %76, %43 : vector<32x32xf32>
    %78 = arith.mulf %77, %74 : vector<32x32xf32>
    %79 = arith.addf %75, %78 : vector<32x32xf32>
    %cst_65 = arith.constant 0.000000e+00 : f32
    %80 = vector.broadcast %cst_65 : f32 to vector<32x32xf32>
    %81 = arith.maximumf %79, %80 : vector<32x32xf32>
    %c0_66 = arith.constant 0 : index
    %c0_67 = arith.constant 0 : index
    %c0_68 = arith.constant 0 : index
    %82 = vector.load %arg6[%c0_66, %c0_67, %c0_68] : memref<2x32x32xf32, #tpu.memory_space<vmem>>, vector<1x32x32xf32>
    %83 = vector.shape_cast %82 : vector<1x32x32xf32> to vector<32x32xf32>
    %84 = vector.shape_cast %81 : vector<32x32xf32> to vector<1x32x32xf32>
    tpu.vector_store %arg6[%c0_66, %c0_67, %c0_68], %84 {strides = array<i32>} : memref<2x32x32xf32, #tpu.memory_space<vmem>>, vector<1x32x32xf32>,
    %c1_69 = arith.constant 1 : index
    %c0_70 = arith.constant 0 : index
    %c0_71 = arith.constant 0 : index
    %85 = vector.load %arg2[%c1_69, %c0_70, %c0_71] : memref<2x32x32xf32, #tpu.memory_space<vmem>>, vector<1x32x32xf32>
    %86 = vector.shape_cast %85 : vector<1x32x32xf32> to vector<32x32xf32>
    %87 = tpu.concatenate %81, %86 in 1 : vector<32x32xf32>, vector<32x32xf32> -> vector<32x64xf32>
    %c1_72 = arith.constant 1 : index
    %c0_73 = arith.constant 0 : index
    %c0_74 = arith.constant 0 : index
    %c0_75 = arith.constant 0 : index
    %88 = vector.load %arg3[%c1_72, %c0_73, %c0_74, %c0_75] : memref<2x5x64x128xf32, #tpu.memory_space<vmem>>, vector<1x1x64x128xf32>
    %89 = vector.shape_cast %88 : vector<1x1x64x128xf32> to vector<64x128xf32>
    %cst_76 = arith.constant dense<0.000000e+00> : vector<32x128xf32>
    %90 = tpu.matmul %87, %89, %cst_76 {dimension_numbers = #tpu.dot_dimension_numbers<[1], [0], [0], [1], [0, 0, 1, 1], [], []>} : vector<32x64xf32>, vector<64x128xf32>, vector<32x128xf32> -> vector<32x128xf32>
    %cst_77 = arith.constant dense<0.000000e+00> : vector<32x64xf32>
    %91 = tpu.matmul %0, %87, %cst_77 {dimension_numbers = #tpu.dot_dimension_numbers<[1], [0], [0], [1], [0, 0, 1, 1], [], []>} : vector<32x32xf32>, vector<32x64xf32>, vector<32x64xf32> -> vector<32x64xf32>
    %c1_78 = arith.constant 1 : index
    %c1_79 = arith.constant 1 : index
    %c0_80 = arith.constant 0 : index
    %c0_81 = arith.constant 0 : index
    %92 = vector.load %arg3[%c1_78, %c1_79, %c0_80, %c0_81] : memref<2x5x64x128xf32, #tpu.memory_space<vmem>>, vector<1x1x64x128xf32>
    %93 = vector.shape_cast %92 : vector<1x1x64x128xf32> to vector<64x128xf32>
    %cst_82 = arith.constant dense<0.000000e+00> : vector<32x128xf32>
    %94 = tpu.matmul %91, %93, %cst_82 {dimension_numbers = #tpu.dot_dimension_numbers<[1], [0], [0], [1], [0, 0, 1, 1], [], []>} : vector<32x64xf32>, vector<64x128xf32>, vector<32x128xf32> -> vector<32x128xf32>
    %95 = arith.addf %90, %94 : vector<32x128xf32>
    %cst_83 = arith.constant dense<0.000000e+00> : vector<32x64xf32>
    %96 = tpu.matmul %2, %91, %cst_83 {dimension_numbers = #tpu.dot_dimension_numbers<[1], [0], [0], [1], [0, 0, 1, 1], [], []>} : vector<32x32xf32>, vector<32x64xf32>, vector<32x64xf32> -> vector<32x64xf32>
    %97 = arith.subf %96, %87 : vector<32x64xf32>
    %c1_84 = arith.constant 1 : index
    %c2_85 = arith.constant 2 : index
    %c0_86 = arith.constant 0 : index
    %c0_87 = arith.constant 0 : index
    %98 = vector.load %arg3[%c1_84, %c2_85, %c0_86, %c0_87] : memref<2x5x64x128xf32, #tpu.memory_space<vmem>>, vector<1x1x64x128xf32>
    %99 = vector.shape_cast %98 : vector<1x1x64x128xf32> to vector<64x128xf32>
    %cst_88 = arith.constant dense<0.000000e+00> : vector<32x128xf32>
    %100 = tpu.matmul %97, %99, %cst_88 {dimension_numbers = #tpu.dot_dimension_numbers<[1], [0], [0], [1], [0, 0, 1, 1], [], []>} : vector<32x64xf32>, vector<64x128xf32>, vector<32x128xf32> -> vector<32x128xf32>
    %101 = arith.addf %95, %100 : vector<32x128xf32>
    %cst_89 = arith.constant dense<0.000000e+00> : vector<32x64xf32>
    %102 = tpu.matmul %2, %97, %cst_89 {dimension_numbers = #tpu.dot_dimension_numbers<[1], [0], [0], [1], [0, 0, 1, 1], [], []>} : vector<32x32xf32>, vector<32x64xf32>, vector<32x64xf32> -> vector<32x64xf32>
    %103 = arith.subf %102, %91 : vector<32x64xf32>
    %c1_90 = arith.constant 1 : index
    %c3_91 = arith.constant 3 : index
    %c0_92 = arith.constant 0 : index
    %c0_93 = arith.constant 0 : index
    %104 = vector.load %arg3[%c1_90, %c3_91, %c0_92, %c0_93] : memref<2x5x64x128xf32, #tpu.memory_space<vmem>>, vector<1x1x64x128xf32>
    %105 = vector.shape_cast %104 : vector<1x1x64x128xf32> to vector<64x128xf32>
    %cst_94 = arith.constant dense<0.000000e+00> : vector<32x128xf32>
    %106 = tpu.matmul %103, %105, %cst_94 {dimension_numbers = #tpu.dot_dimension_numbers<[1], [0], [0], [1], [0, 0, 1, 1], [], []>} : vector<32x64xf32>, vector<64x128xf32>, vector<32x128xf32> -> vector<32x128xf32>
    %107 = arith.addf %101, %106 : vector<32x128xf32>
    %cst_95 = arith.constant dense<0.000000e+00> : vector<32x64xf32>
    %108 = tpu.matmul %2, %103, %cst_95 {dimension_numbers = #tpu.dot_dimension_numbers<[1], [0], [0], [1], [0, 0, 1, 1], [], []>} : vector<32x32xf32>, vector<32x64xf32>, vector<32x64xf32> -> vector<32x64xf32>
    %109 = arith.subf %108, %97 : vector<32x64xf32>
    %c1_96 = arith.constant 1 : index
    %c4_97 = arith.constant 4 : index
    %c0_98 = arith.constant 0 : index
    %c0_99 = arith.constant 0 : index
    %110 = vector.load %arg3[%c1_96, %c4_97, %c0_98, %c0_99] : memref<2x5x64x128xf32, #tpu.memory_space<vmem>>, vector<1x1x64x128xf32>
    %111 = vector.shape_cast %110 : vector<1x1x64x128xf32> to vector<64x128xf32>
    %cst_100 = arith.constant dense<0.000000e+00> : vector<32x128xf32>
    %112 = tpu.matmul %109, %111, %cst_100 {dimension_numbers = #tpu.dot_dimension_numbers<[1], [0], [0], [1], [0, 0, 1, 1], [], []>} : vector<32x64xf32>, vector<64x128xf32>, vector<32x128xf32> -> vector<32x128xf32>
    %113 = arith.addf %107, %112 : vector<32x128xf32>
    %c1_101 = arith.constant 1 : index
    %c0_102 = arith.constant 0 : index
    %c0_103 = arith.constant 0 : index
    %114 = vector.load %arg5[%c1_101, %c0_102, %c0_103] : memref<2x1x128xf32, #tpu.memory_space<vmem>>, vector<1x1x128xf32>
    %115 = vector.shape_cast %114 : vector<1x1x128xf32> to vector<1x128xf32>
    %116 = vector.broadcast %115 : vector<1x128xf32> to vector<32x128xf32>
    %117 = arith.addf %113, %116 : vector<32x128xf32>
    %118 = vector.extract_strided_slice %117 {offsets = [0, 0], sizes = [32, 64], strides = [1, 1]} : vector<32x128xf32> to vector<32x64xf32>
    %119 = arith.negf %118 : vector<32x64xf32>
    %120 = math.exp %119 : vector<32x64xf32>
    %cst_104 = arith.constant 1.000000e+00 : f32
    %121 = vector.broadcast %cst_104 : f32 to vector<32x64xf32>
    %122 = arith.addf %121, %120 : vector<32x64xf32>
    %123 = arith.divf %121, %122 : vector<32x64xf32>
    %124 = vector.extract_strided_slice %123 {offsets = [0, 0], sizes = [32, 32], strides = [1, 1]} : vector<32x64xf32> to vector<32x32xf32>
    %125 = vector.extract_strided_slice %123 {offsets = [0, 32], sizes = [32, 32], strides = [1, 1]} : vector<32x64xf32> to vector<32x32xf32>
    %126 = vector.extract_strided_slice %117 {offsets = [0, 64], sizes = [32, 32], strides = [1, 1]} : vector<32x128xf32> to vector<32x32xf32>
    %127 = arith.mulf %86, %125 : vector<32x32xf32>
    %c1_105 = arith.constant 1 : index
    %c0_106 = arith.constant 0 : index
    %c0_107 = arith.constant 0 : index
    %c0_108 = arith.constant 0 : index
    %128 = vector.load %arg4[%c1_105, %c0_106, %c0_107, %c0_108] : memref<2x5x32x32xf32, #tpu.memory_space<vmem>>, vector<1x1x32x32xf32>
    %129 = vector.shape_cast %128 : vector<1x1x32x32xf32> to vector<32x32xf32>
    %cst_109 = arith.constant dense<0.000000e+00> : vector<32x32xf32>
    %130 = tpu.matmul %127, %129, %cst_109 {dimension_numbers = #tpu.dot_dimension_numbers<[1], [0], [0], [1], [0, 0, 1, 1], [], []>} : vector<32x32xf32>, vector<32x32xf32>, vector<32x32xf32> -> vector<32x32xf32>
    %cst_110 = arith.constant dense<0.000000e+00> : vector<32x32xf32>
    %131 = tpu.matmul %0, %127, %cst_110 {dimension_numbers = #tpu.dot_dimension_numbers<[1], [0], [0], [1], [0, 0, 1, 1], [], []>} : vector<32x32xf32>, vector<32x32xf32>, vector<32x32xf32> -> vector<32x32xf32>
    %c1_111 = arith.constant 1 : index
    %c1_112 = arith.constant 1 : index
    %c0_113 = arith.constant 0 : index
    %c0_114 = arith.constant 0 : index
    %132 = vector.load %arg4[%c1_111, %c1_112, %c0_113, %c0_114] : memref<2x5x32x32xf32, #tpu.memory_space<vmem>>, vector<1x1x32x32xf32>
    %133 = vector.shape_cast %132 : vector<1x1x32x32xf32> to vector<32x32xf32>
    %cst_115 = arith.constant dense<0.000000e+00> : vector<32x32xf32>
    %134 = tpu.matmul %131, %133, %cst_115 {dimension_numbers = #tpu.dot_dimension_numbers<[1], [0], [0], [1], [0, 0, 1, 1], [], []>} : vector<32x32xf32>, vector<32x32xf32>, vector<32x32xf32> -> vector<32x32xf32>
    %135 = arith.addf %130, %134 : vector<32x32xf32>
    %cst_116 = arith.constant dense<0.000000e+00> : vector<32x32xf32>
    %136 = tpu.matmul %2, %131, %cst_116 {dimension_numbers = #tpu.dot_dimension_numbers<[1], [0], [0], [1], [0, 0, 1, 1], [], []>} : vector<32x32xf32>, vector<32x32xf32>, vector<32x32xf32> -> vector<32x32xf32>
    %137 = arith.subf %136, %127 : vector<32x32xf32>
    %c1_117 = arith.constant 1 : index
    %c2_118 = arith.constant 2 : index
    %c0_119 = arith.constant 0 : index
    %c0_120 = arith.constant 0 : index
    %138 = vector.load %arg4[%c1_117, %c2_118, %c0_119, %c0_120] : memref<2x5x32x32xf32, #tpu.memory_space<vmem>>, vector<1x1x32x32xf32>
    %139 = vector.shape_cast %138 : vector<1x1x32x32xf32> to vector<32x32xf32>
    %cst_121 = arith.constant dense<0.000000e+00> : vector<32x32xf32>
    %140 = tpu.matmul %137, %139, %cst_121 {dimension_numbers = #tpu.dot_dimension_numbers<[1], [0], [0], [1], [0, 0, 1, 1], [], []>} : vector<32x32xf32>, vector<32x32xf32>, vector<32x32xf32> -> vector<32x32xf32>
    %141 = arith.addf %135, %140 : vector<32x32xf32>
    %cst_122 = arith.constant dense<0.000000e+00> : vector<32x32xf32>
    %142 = tpu.matmul %2, %137, %cst_122 {dimension_numbers = #tpu.dot_dimension_numbers<[1], [0], [0], [1], [0, 0, 1, 1], [], []>} : vector<32x32xf32>, vector<32x32xf32>, vector<32x32xf32> -> vector<32x32xf32>
    %143 = arith.subf %142, %131 : vector<32x32xf32>
    %c1_123 = arith.constant 1 : index
    %c3_124 = arith.constant 3 : index
    %c0_125 = arith.constant 0 : index
    %c0_126 = arith.constant 0 : index
    %144 = vector.load %arg4[%c1_123, %c3_124, %c0_125, %c0_126] : memref<2x5x32x32xf32, #tpu.memory_space<vmem>>, vector<1x1x32x32xf32>
    %145 = vector.shape_cast %144 : vector<1x1x32x32xf32> to vector<32x32xf32>
    %cst_127 = arith.constant dense<0.000000e+00> : vector<32x32xf32>
    %146 = tpu.matmul %143, %145, %cst_127 {dimension_numbers = #tpu.dot_dimension_numbers<[1], [0], [0], [1], [0, 0, 1, 1], [], []>} : vector<32x32xf32>, vector<32x32xf32>, vector<32x32xf32> -> vector<32x32xf32>
    %147 = arith.addf %141, %146 : vector<32x32xf32>
    %cst_128 = arith.constant dense<0.000000e+00> : vector<32x32xf32>
    %148 = tpu.matmul %2, %143, %cst_128 {dimension_numbers = #tpu.dot_dimension_numbers<[1], [0], [0], [1], [0, 0, 1, 1], [], []>} : vector<32x32xf32>, vector<32x32xf32>, vector<32x32xf32> -> vector<32x32xf32>
    %149 = arith.subf %148, %137 : vector<32x32xf32>
    %c1_129 = arith.constant 1 : index
    %c4_130 = arith.constant 4 : index
    %c0_131 = arith.constant 0 : index
    %c0_132 = arith.constant 0 : index
    %150 = vector.load %arg4[%c1_129, %c4_130, %c0_131, %c0_132] : memref<2x5x32x32xf32, #tpu.memory_space<vmem>>, vector<1x1x32x32xf32>
    %151 = vector.shape_cast %150 : vector<1x1x32x32xf32> to vector<32x32xf32>
    %cst_133 = arith.constant dense<0.000000e+00> : vector<32x32xf32>
    %152 = tpu.matmul %149, %151, %cst_133 {dimension_numbers = #tpu.dot_dimension_numbers<[1], [0], [0], [1], [0, 0, 1, 1], [], []>} : vector<32x32xf32>, vector<32x32xf32>, vector<32x32xf32> -> vector<32x32xf32>
    %153 = arith.addf %147, %152 : vector<32x32xf32>
    %154 = arith.addf %126, %153 : vector<32x32xf32>
    %155 = math.tanh %154 : vector<32x32xf32>
    %156 = arith.mulf %124, %86 : vector<32x32xf32>
    %cst_134 = arith.constant 1.000000e+00 : f32
    %157 = vector.broadcast %cst_134 : f32 to vector<32x32xf32>
    %158 = arith.subf %157, %124 : vector<32x32xf32>
    %159 = arith.mulf %158, %155 : vector<32x32xf32>
    %160 = arith.addf %156, %159 : vector<32x32xf32>
    %cst_135 = arith.constant 0.000000e+00 : f32
    %161 = vector.broadcast %cst_135 : f32 to vector<32x32xf32>
    %162 = arith.maximumf %160, %161 : vector<32x32xf32>
    %c1_136 = arith.constant 1 : index
    %c0_137 = arith.constant 0 : index
    %c0_138 = arith.constant 0 : index
    %163 = vector.load %arg6[%c1_136, %c0_137, %c0_138] : memref<2x32x32xf32, #tpu.memory_space<vmem>>, vector<1x32x32xf32>
    %164 = vector.shape_cast %163 : vector<1x32x32xf32> to vector<32x32xf32>
    %165 = vector.shape_cast %162 : vector<32x32xf32> to vector<1x32x32xf32>
    tpu.vector_store %arg6[%c1_136, %c0_137, %c0_138], %165 {strides = array<i32>} : memref<2x32x32xf32, #tpu.memory_space<vmem>>, vector<1x32x32xf32>,
    return
  }
}

</mosaic_0001>

<bundles_post_ra>
// kernel: _fused_forward.1
= control target key start
LH: loop header
LB: loop body
LE: loop exit
PB: predicated region body
PF: predicated region fallthrough
CT: control target
= control target key end

     0   :  { %11 = vsyncpa [#allocation3], 0  ;;  %s6014_s0 = inlined_call_operand.vmem [shape: f32[32,32], index: 0, kind: input, shape index: {}]   ;;  %s6015_s1 = inlined_call_operand.vmem [shape: f32[32,32], index: 1, kind: input, shape index: {}]   ;;  %s6016_s2 = inlined_call_operand.vmem [shape: f32[2,32,32], index: 2, kind: input, shape index: {}]   ;;  %s6017_s3 = inlined_call_operand.hbm [shape: f32[2,5,64,128], index: 3, kind: input, shape index: {}]   ;;  %s6018_s4 = inlined_call_operand.hbm [shape: f32[2,5,32,32], index: 4, kind: input, shape index: {}]   ;;  %s6019_s5 = inlined_call_operand.vmem [shape: f32[2,1,128], index: 5, kind: input, shape index: {}]   ;;  %s6020_s6 = inlined_call_operand.hbm [shape: f32[2,32,32], index: 6, kind: output, shape index: {}]  }
   0x1   :  { %12 = vsyncpa [#allocation6], 0 }
   0x2   :  { %13 = vsyncpa [#allocation4], 0  ;;  %s5136_s21 = smov [#allocation2]  }
   0x3   :  { %s25_s22 = sshll.u32 %s5136_s21, 4  ;;  %s26_s22 = int_to_ptr.vmem [resolvable:$true] %s25_s22 }
   0x4   :  { %s5078_s23 = scalar_lea.vmem %s26_s22, 10240  ;;  %p5083_p1 = scmp.lt.s32.totalorder %s26_s22, %s26_s22 }
   0x5   :  { %p5079_p0 = scmp.ne.s32.totalorder %s26_s22, %s5078_s23  ;;  %p5084_p2 = scmp.lt.s32.totalorder %s5078_s23, %s5078_s23 }
   0x7   :  { %p5085_p3 = por %p5084_p2, %p5083_p1 }
   0x9   :  { %p5086_p4 = pnand %p5085_p3, %p5079_p0 }
   0xb   :  { %5089 = shalt.err (!%p5086_p4)
}
   0xc   :  { %s5137_s24 = smov 128   ;;  %s5138_s25 = smov 8  }
   0xd   :  { %31 = dma.hbm_to_vmem [thread:$0]  %s6017_s3, 10240, %s26_s22, [#allocation3], %s5137_s24, %s5137_s24, %s5138_s25  }
   0xe   :  { %s5139_s28 = smov [#allocation5]  }
   0xf   :  { %s37_s29 = sshll.u32 %s5139_s28, 4  ;;  %s38_s29 = int_to_ptr.vmem [resolvable:$true] %s37_s29 }
  0x10   :  { %s5098_s30 = scalar_lea.vmem %s38_s29, 5120  ;;  %p5103_p6 = scmp.lt.s32.totalorder %s38_s29, %s38_s29 }
  0x11   :  { %p5099_p5 = scmp.ne.s32.totalorder %s38_s29, %s5098_s30  ;;  %p5104_p7 = scmp.lt.s32.totalorder %s5098_s30, %s5098_s30 }
  0x13   :  { %p5105_p8 = por %p5104_p7, %p5103_p6 }
  0x15   :  { %p5106_p9 = pnand %p5105_p8, %p5099_p5 }
  0x17   :  { %5109 = shalt.err (!%p5106_p9)
}
  0x18   :  { %43 = dma.hbm_to_vmem [thread:$0]  %s6018_s4, 5120, %s38_s29, [#allocation6], %s5137_s24, %s5137_s24, %s5138_s25  }
  0x19   :  { %5130 = dma.done.wait [#allocation3], 10240  }
  0x1a   :  { %5131 = vsyncadd [#allocation3], 4294957056 }
  0x1b   :  { %5132 = dma.done.wait [#allocation6], 5120  }
  0x1c   :  { %5133 = vsyncadd [#allocation6], 4294962176  ;;  %v5194_v0 = vld [vmem:[%s6016_s2 + $0x18] sm:$0xff]  ;;  %v5199_v1 = vld [vmem:[%s6016_s2 + $0x8] sm:$0xff]  ;;  %s5140_s12 = smov 32   ;;  %vm84_vm0 = vcmask 261120  }
  0x1d   :  { %78 = vrot.lane.b32.xlu0 %v5194_v0, %s5140_s12  ;;  %74 = vrot.lane.b32.xlu1 %v5199_v1, %s5140_s12  ;;  %v5208_v2 = vld [vmem:[%s6016_s2 + $0x10] sm:$0xff]  ;;  %v5213_v3 = vld [vmem:[%s6016_s2] sm:$0xff]  ;;  %v202_v5 = vld [vmem:[#allocation2 + $0x78] sm:$0xff]  ;;  %vm203_vm1 = vcmask 523264   ;;  %s5141_s10 = smov 96   ;;  %s5142_s11 = smov 64  }
  0x1e   :  { %v5218_v4 = vld [vmem:[%s6014_s0] sm:$0xff]  ;;  %v201_v6 = vld [vmem:[#allocation2 + $0x70] sm:$0xff]  ;;  %4432 = vmatprep.subr.mxu1 %v202_v5  ;;  %v200_v7 = vld [vmem:[#allocation2 + $0x68] sm:$0xff]  ;;  %s5143_s19 = smov [#allocation7]  }
  0x1f   :  { %4426 = vmatprep.mubr.msk.f32.mxu0 %vm84_vm0, %v5218_v4  ;;  %4433 = vmatpush3.msra.mxu1 %v202_v5  ;;  %v199_v8 = vld [vmem:[#allocation2 + $0x60] sm:$0xff]  ;;  %v198_v9 = vld [vmem:[#allocation2 + $0x58] sm:$0xff]  ;;  %v197_v10 = vld [vmem:[#allocation2 + $0x50] sm:$0xff]  ;;  %v5298_v40 = vmul.f32 2.0, %v5218_v4 }
  0x20   :  { %4434 = vmatprep.subr.mxu1 %v201_v6  ;;  %v63_v11 = vld [vmem:[%s6015_s1 + $0x18] sm:$0xff]  ;;  %v62_v15 = vld [vmem:[%s6015_s1 + $0x10] sm:$0xff]  ;;  %v61_v17 = vld [vmem:[%s6015_s1 + $0x8] sm:$0xff] }
  0x21   :  { %76 = vrot.lane.b32.xlu0 %v5208_v2, %s5140_s12  ;;  %72 = vrot.lane.b32.xlu1 %v5213_v3, %s5140_s12  ;;  %v60_v19 = vld [vmem:[%s6015_s1] sm:$0xff]  ;;  %v5259_v23 = vld [vmem:[%s6014_s0 + $0x8] sm:$0xff]  ;;  %v96_v24 = vld [vmem:[#allocation2 + $0x38] sm:$0xff] }
  0x22   :  { %4435 = vmatpush3.msra.mxu1 %v201_v6  ;;  %v5265_v25 = vld [vmem:[%s6014_s0 + $0x10] sm:$0xff]  ;;  %v5275_v27 = vld [vmem:[%s6014_s0 + $0x18] sm:$0xff]  ;;  %v94_v28 = vld [vmem:[#allocation2 + $0x28] sm:$0xff]  ;;  %v5313_v42 = vmul.f32 2.0, %v5259_v23 }
  0x23   :  { %4436 = vmatprep.subr.mxu1 %v200_v7  ;;  %v95_v26 = vld [vmem:[#allocation2 + $0x30] sm:$0xff]  ;;  %v93_v29 = vld [vmem:[#allocation2 + $0x20] sm:$0xff]  ;;  %v92_v30 = vld [vmem:[#allocation2 + $0x18] sm:$0xff]  ;;  %v5317_v43 = vmul.f32 2.0, %v5265_v25  ;;  %v5323_v44 = vmul.f32 2.0, %v5275_v27 }
  0x24   :  { %4437 = vmatpush3.msra.mxu1 %v200_v7  ;;  %v91_v31 = vld [vmem:[#allocation2 + $0x10] sm:$0xff]  ;;  %v90_v32 = vld [vmem:[#allocation2 + $0x8] sm:$0xff]  ;;  %v89_v33 = vld [vmem:[#allocation2] sm:$0xff] }
  0x25   :  { %4438 = vmatprep.subr.mxu1 %v199_v8  ;;  %v196_v34 = vld [vmem:[#allocation2 + $0x48] sm:$0xff]  ;;  %v195_v35 = vld [vmem:[#allocation2 + $0x40] sm:$0xff]  ;;  %v507_v36 = vld [vmem:[#allocation2 + $0xb8] sm:$0xff] }
  0x26   :  { %4439 = vmatpush3.msra.mxu1 %v199_v8  ;;  %v506_v45 = vld [vmem:[#allocation2 + $0xb0] sm:$0xff]  ;;  %v505_v46 = vld [vmem:[#allocation2 + $0xa8] sm:$0xff]  ;;  %v504_v47 = vld [vmem:[#allocation2 + $0xa0] sm:$0xff] }
  0x27   :  { %4440 = vmatprep.subr.mxu1 %v198_v9  ;;  %v503_v48 = vld [vmem:[#allocation2 + $0x98] sm:$0xff]  ;;  %v502_v49 = vld [vmem:[#allocation2 + $0x90] sm:$0xff]  ;;  %v501_v50 = vld [vmem:[#allocation2 + $0x88] sm:$0xff] }
  0x28   :  { %4441 = vmatpush3.msra.mxu1 %v198_v9  ;;  %v500_v51 = vld [vmem:[#allocation2 + $0x80] sm:$0xff]  ;;  %v706_v5 = vld [vmem:[#allocation2 + $0xf8] sm:$0xff]  ;;  %v705_v6 = vld [vmem:[#allocation2 + $0xf0] sm:$0xff] }
  0x29   :  { %4442 = vmatprep.subr.mxu1 %v197_v10  ;;  %v704_v7 = vld [vmem:[#allocation2 + $0xe8] sm:$0xff]  ;;  %v703_v8 = vld [vmem:[#allocation2 + $0xe0] sm:$0xff]  ;;  %v702_v9 = vld [vmem:[#allocation2 + $0xd8] sm:$0xff] }
  0x2a   :  { %4443 = vmatpush3.msra.mxu1 %v197_v10  ;;  %v701_v10 = vld [vmem:[#allocation2 + $0xd0] sm:$0xff] }
  0x2b   :  { %4444 = vmatprep.subr.mxu1 %v196_v34 }
  0x2c   :  { %4445 = vmatpush3.msra.mxu1 %v196_v34 }
  0x2d   :  { %4446 = vmatprep.subr.mxu1 %v195_v35 }
  0x2e   :  { %4447 = vmatpush3.msra.mxu1 %v195_v35 }
  0x8f   :  { %v79_v12 = vpop.permute.xlu0 %78  ;;  %v75_v13 = vpop.permute.xlu1 %74 }
  0x90   :  { %v5230_v14 = vsel %vm84_vm0, %v63_v11, %v79_v12  ;;  %v5248_v21 = vsel %vm84_vm0, %v61_v17, %v75_v13  ;;  %v700_v11 = vld [vmem:[#allocation2 + $0xc8] sm:$0xff]  ;;  %v699_v12 = vld [vmem:[#allocation2 + $0xc0] sm:$0xff] }
  0x91   :  { %4418 = vmatprep.subr.mxu0 %v5230_v14 }
  0x92   :  { %4419 = vmatpush3.msra.mxu0 %v5230_v14 }
  0x93   :  { %v77_v16 = vpop.permute.xlu0 %76  ;;  %v73_v18 = vpop.permute.xlu1 %72 }
  0x94   :  { %v5244_v20 = vsel %vm84_vm0, %v62_v15, %v77_v16  ;;  %v5252_v22 = vsel %vm84_vm0, %v60_v19, %v73_v18 }
  0x95   :  { %4420 = vmatprep.subr.mxu0 %v5244_v20 }
  0x96   :  { %4421 = vmatpush3.msra.mxu0 %v5244_v20 }
  0x97   :  { %4422 = vmatprep.subr.mxu0 %v5248_v21 }
  0x98   :  { %4423 = vmatpush3.msra.mxu0 %v5248_v21 }
  0x99   :  { %4424 = vmatprep.subr.mxu0 %v5252_v22 }
  0x9a   :  { %4425 = vmatpush3.msra.mxu0 %v5252_v22 }
  0x9b   :  { %4427 = vmatmul.mubr.msk.f32.vlgmr.msra.gmra.mxu0 %vm84_vm0, %v5259_v23  ;;  %4454 = vmatprep.subr.mxu0 %v96_v24 }
  0x9c   :  { %4455 = vmatpush3.msra.mxu0 %v96_v24  ;;  %4429 = vmatprep.mubr.msk.f32.mxu0 %vm84_vm0, %v5265_v25 }
  0x9d   :  { %4456 = vmatprep.subr.mxu0 %v95_v26 }
  0x9e   :  { %4457 = vmatpush3.msra.mxu0 %v95_v26 }
  0x9f   :  { %4430 = vmatmul.mubr.msk.f32.gmra.mxu0 %vm84_vm0, %v5275_v27  ;;  %4458 = vmatprep.subr.mxu0 %v94_v28 }
  0xa0   :  { %4459 = vmatpush3.msra.mxu0 %v94_v28  ;;  %4470 = vmatprep.mubr.msk.f32.mxu0 %vm203_vm1, %v5252_v22 }
  0xa1   :  { %4460 = vmatprep.subr.mxu0 %v93_v29 }
  0xa2   :  { %4461 = vmatpush3.msra.mxu0 %v93_v29 }
  0xa3   :  { %4462 = vmatprep.subr.mxu0 %v92_v30 }
  0xa4   :  { %4463 = vmatpush3.msra.mxu0 %v92_v30 }
  0xa5   :  { %4464 = vmatprep.subr.mxu0 %v91_v31 }
  0xa6   :  { %4465 = vmatpush3.msra.mxu0 %v91_v31 }
  0xa7   :  { %4466 = vmatprep.subr.mxu0 %v90_v32 }
  0xa8   :  { %4467 = vmatpush3.msra.mxu0 %v90_v32 }
  0xa9   :  { %4468 = vmatprep.subr.mxu0 %v89_v33 }
  0xaa   :  { %4469 = vmatpush3.msra.mxu0 %v89_v33 }
  0xab   :  { %4471 = vmatmul.mubr.msk.f32.vlgmr.msra.gmra.mxu0 %vm203_vm1, %v5248_v21  ;;  %4490 = vmatprep.subr.mxu0 %v507_v36 }
  0xac   :  { %4473 = vmatprep.mubr.msk.f32.mxu0 %vm203_vm1, %v5244_v20  ;;  %4491 = vmatpush3.msra.mxu0 %v507_v36 }
  0xad   :  { %4492 = vmatprep.subr.mxu0 %v506_v45 }
  0xae   :  { %4493 = vmatpush3.msra.mxu0 %v506_v45  ;;  %v901_v45 = vld [vmem:[#allocation2 + $0x118] sm:$0xff] }
  0xaf   :  { %4474 = vmatmul.mubr.msk.f32.gmra.mxu0 %vm203_vm1, %v5230_v14  ;;  %4494 = vmatprep.subr.mxu0 %v505_v46 }
  0xb0   :  { %4495 = vmatpush3.msra.mxu0 %v505_v46  ;;  %v900_v46 = vld [vmem:[#allocation2 + $0x110] sm:$0xff] }
  0xb1   :  { %4496 = vmatprep.subr.mxu0 %v504_v47 }
  0xb2   :  { %4497 = vmatpush3.msra.mxu0 %v504_v47  ;;  %v899_v47 = vld [vmem:[#allocation2 + $0x108] sm:$0xff] }
  0xb3   :  { %4498 = vmatprep.subr.mxu0 %v503_v48 }
  0xb4   :  { %4499 = vmatpush3.msra.mxu0 %v503_v48  ;;  %v898_v48 = vld [vmem:[#allocation2 + $0x100] sm:$0xff] }
  0xb5   :  { %4500 = vmatprep.subr.mxu0 %v502_v49 }
  0xb6   :  { %4501 = vmatpush3.msra.mxu0 %v502_v49 }
  0xb7   :  { %4502 = vmatprep.subr.mxu0 %v501_v50 }
  0xb8   :  { %4503 = vmatpush3.msra.mxu0 %v501_v50 }
  0xb9   :  { %4504 = vmatprep.subr.mxu0 %v500_v51 }
  0xba   :  { %4505 = vmatpush3.msra.mxu0 %v500_v51 }
 0x15b   :  { %v5287_v37 = vpop.f32.mrf.mxu0 }
 0x15d   :  { %v5289_v38 = vpop.f32.mrf.mxu0 }
 0x15e   :  { %4448 = vmatprep.mubr.msk.f32.mxu1 %vm203_vm1, %v5289_v38 }
 0x15f   :  { %v5293_v39 = vpop.f32.mrf.mxu0  ;;  %4449 = vmatmul.mubr.msk.f32.vlgmr.msra.gmra.mxu1 %vm203_vm1, %v5287_v37 }
 0x160   :  { %4476 = vmatprep.subr.mxu1 %v5293_v39 }
 0x161   :  { %v5301_v41 = vpop.f32.mrf.mxu0  ;;  %4477 = vmatpush3.msra.mxu1 %v5293_v39 }
 0x162   :  { %4451 = vmatprep.mubr.msk.f32.mxu1 %vm203_vm1, %v5301_v41  ;;  %4478 = vmatprep.subr.mxu1 %v5301_v41 }
 0x163   :  { %4452 = vmatmul.mubr.msk.f32.gmra.mxu1 %vm203_vm1, %v5293_v39 }
 0x164   :  { %4479 = vmatpush3.msra.mxu1 %v5301_v41  ;;  %4484 = vmatprep.mubr.msk.f32.mxu1 %vm84_vm0, %v5298_v40 }
 0x165   :  { %4480 = vmatprep.subr.mxu1 %v5287_v37 }
 0x166   :  { %4481 = vmatpush3.msra.mxu1 %v5287_v37 }
 0x167   :  { %4482 = vmatprep.subr.mxu1 %v5289_v38 }
 0x168   :  { %4483 = vmatpush3.msra.mxu1 %v5289_v38 }
 0x169   :  { %4485 = vmatmul.mubr.msk.f32.vlgmr.msra.gmra.mxu1 %vm84_vm0, %v5313_v42 }
 0x16a   :  { %4487 = vmatprep.mubr.msk.f32.mxu1 %vm84_vm0, %v5317_v43 }
 0x16b   :  { %v4472_v13 = vpop.f32.mrf.mxu0 }
 0x16d   :  { %4488 = vmatmul.mubr.msk.f32.gmra.mxu1 %vm84_vm0, %v5323_v44 }
 0x16e   :  { %4520 = vmatprep.mubr.msk.f32.mxu1 %vm84_vm0, %v5298_v40 }
 0x21f   :  { %v4450_v52 = vpop.f32.mrf.mxu1 }
 0x220   :  { %v385_v17 = vadd.f32 %v4472_v13, %v4450_v52 }
 0x221   :  { %v282_v53 = vpop.f32.mrf.mxu1 }
 0x223   :  { %v4453_v54 = vpop.f32.mrf.mxu1 }
 0x225   :  { %v5333_v55 = vpop.f32.mrf.mxu1 }
 0x229   :  { %v4486_v56 = vpop.f32.mrf.mxu1 }
 0x22a   :  { %v5339_v59 = vsub.f32 %v4486_v56, %v5248_v21 }
 0x22b   :  { %v476_v57 = vpop.f32.mrf.mxu1 }
 0x22c   :  { %v5336_v58 = vsub.f32 %v476_v57, %v5252_v22 }
 0x22d   :  { %v4489_v60 = vpop.f32.mrf.mxu1 }
 0x22e   :  { %v5342_v61 = vsub.f32 %v4489_v60, %v5230_v14  ;;  %4506 = vmatprep.mubr.msk.f32.mxu0 %vm203_vm1, %v5336_v58  ;;  %v379_v14 = vpop.f32.mrf.mxu0 }
 0x22f   :  { %v486_v62 = vpop.f32.mrf.mxu1  ;;  %4507 = vmatmul.mubr.msk.f32.vlgmr.msra.gmra.mxu0 %vm203_vm1, %v5339_v59  ;;  %v380_v19 = vadd.f32 %v379_v14, %v282_v53 }
 0x230   :  { %v5349_v63 = vsub.f32 %v486_v62, %v5244_v20  ;;  %4512 = vmatprep.subr.mxu1 %v5342_v61  ;;  %v4475_v15 = vpop.f32.mrf.mxu0 }
 0x231   :  { %4513 = vmatpush3.msra.mxu1 %v5342_v61  ;;  %v395_v22 = vadd.f32 %v4475_v15, %v4453_v54 }
 0x232   :  { %4509 = vmatprep.mubr.msk.f32.mxu0 %vm203_vm1, %v5349_v63  ;;  %4514 = vmatprep.subr.mxu1 %v5349_v63  ;;  %v5371_v16 = vpop.f32.mrf.mxu0 }
 0x233   :  { %4510 = vmatmul.mubr.msk.f32.gmra.mxu0 %vm203_vm1, %v5342_v61  ;;  %4515 = vmatpush3.msra.mxu1 %v5349_v63 }
 0x234   :  { %4516 = vmatprep.subr.mxu1 %v5339_v59  ;;  %4556 = vmatprep.mubr.msk.f32.mxu0 %vm84_vm0, %v5298_v40 }
 0x235   :  { %4517 = vmatpush3.msra.mxu1 %v5339_v59 }
 0x236   :  { %4518 = vmatprep.subr.mxu1 %v5336_v58 }
 0x237   :  { %4519 = vmatpush3.msra.mxu1 %v5336_v58 }
 0x238   :  { %4521 = vmatmul.mubr.msk.f32.vlgmr.msra.gmra.mxu1 %vm84_vm0, %v5313_v42  ;;  %4526 = vmatprep.subr.mxu1 %v706_v5 }
 0x239   :  { %4523 = vmatprep.mubr.msk.f32.mxu1 %vm84_vm0, %v5317_v43  ;;  %4527 = vmatpush3.msra.mxu1 %v706_v5 }
 0x23a   :  { %4528 = vmatprep.subr.mxu1 %v705_v6 }
 0x23b   :  { %4529 = vmatpush3.msra.mxu1 %v705_v6 }
 0x23c   :  { %4524 = vmatmul.mubr.msk.f32.gmra.mxu1 %vm84_vm0, %v5323_v44  ;;  %4530 = vmatprep.subr.mxu1 %v704_v7 }
 0x23d   :  { %4531 = vmatpush3.msra.mxu1 %v704_v7  ;;  %v3967_v7 = vld [vmem:[%s6019_s5] ss:$0 sm:$0xff] }
 0x23e   :  { %4532 = vmatprep.subr.mxu1 %v703_v8 }
 0x23f   :  { %4533 = vmatpush3.msra.mxu1 %v703_v8  ;;  %v390_v8 = vadd.f32 %v5371_v16, %v5333_v55 }
 0x240   :  { %4534 = vmatprep.subr.mxu1 %v702_v9 }
 0x241   :  { %4535 = vmatpush3.msra.mxu1 %v702_v9 }
 0x242   :  { %4536 = vmatprep.subr.mxu1 %v701_v10 }
 0x243   :  { %4537 = vmatpush3.msra.mxu1 %v701_v10 }
 0x244   :  { %4538 = vmatprep.subr.mxu1 %v700_v11 }
 0x245   :  { %4539 = vmatpush3.msra.mxu1 %v700_v11 }
 0x246   :  { %4540 = vmatprep.subr.mxu1 %v699_v12 }
 0x247   :  { %4541 = vmatpush3.msra.mxu1 %v699_v12 }
 0x2ef   :  { %v4508_v18 = vpop.f32.mrf.mxu0 }
 0x2f0   :  { %v5373_v20 = vadd.f32 %v4508_v18, %v385_v17 }
 0x2f1   :  { %v586_v21 = vpop.f32.mrf.mxu0 }
 0x2f2   :  { %v5375_v24 = vadd.f32 %v586_v21, %v380_v19 }
 0x2f3   :  { %v4511_v26 = vpop.f32.mrf.mxu0 }
 0x2f4   :  { %v5377_v28 = vadd.f32 %v4511_v26, %v395_v22 }
 0x2f5   :  { %v596_v49 = vpop.f32.mrf.mxu0 }
 0x2f6   :  { %v607_v11 = vadd.f32 %v596_v49, %v390_v8 }
 0x2f8   :  { %v4522_v29 = vpop.f32.mrf.mxu1 }
 0x2f9   :  { %v695_v32 = vsub.f32 %v4522_v29, %v5287_v37  ;;  %v905_v37 = vld [vmem:[#allocation2 + $0x138] sm:$0xff] }
 0x2fa   :  { %v675_v30 = vpop.f32.mrf.mxu1 }
 0x2fb   :  { %v694_v31 = vsub.f32 %v675_v30, %v5289_v38  ;;  %v904_v38 = vld [vmem:[#allocation2 + $0x130] sm:$0xff] }
 0x2fc   :  { %v4525_v33 = vpop.f32.mrf.mxu1 }
 0x2fd   :  { %v697_v34 = vsub.f32 %v4525_v33, %v5293_v39  ;;  %4542 = vmatprep.mubr.msk.f32.mxu1 %vm203_vm1, %v694_v31  ;;  %v903_v39 = vld [vmem:[#allocation2 + $0x128] sm:$0xff] }
 0x2fe   :  { %v685_v35 = vpop.f32.mrf.mxu1  ;;  %4543 = vmatmul.mubr.msk.f32.vlgmr.msra.gmra.mxu1 %vm203_vm1, %v695_v32 }
 0x2ff   :  { %v696_v36 = vsub.f32 %v685_v35, %v5301_v41  ;;  %4548 = vmatprep.subr.mxu0 %v697_v34  ;;  %v902_v41 = vld [vmem:[#allocation2 + $0x120] sm:$0xff] }
 0x300   :  { %4549 = vmatpush3.msra.mxu0 %v697_v34 }
 0x301   :  { %4545 = vmatprep.mubr.msk.f32.mxu1 %vm203_vm1, %v696_v36  ;;  %4550 = vmatprep.subr.mxu0 %v696_v36 }
 0x302   :  { %4546 = vmatmul.mubr.msk.f32.gmra.mxu1 %vm203_vm1, %v697_v34  ;;  %4551 = vmatpush3.msra.mxu0 %v696_v36  ;;  %v1065_v36 = vld [vmem:[#allocation5 + $0x18] sm:$0xff] }
 0x303   :  { %4552 = vmatprep.subr.mxu0 %v695_v32  ;;  %4592 = vmatprep.mubr.msk.f32.mxu1 %vm84_vm0, %v5218_v4 }
 0x304   :  { %4553 = vmatpush3.msra.mxu0 %v695_v32 }
 0x305   :  { %4554 = vmatprep.subr.mxu0 %v694_v31 }
 0x306   :  { %4555 = vmatpush3.msra.mxu0 %v694_v31 }
 0x307   :  { %4557 = vmatmul.mubr.msk.f32.vlgmr.msra.gmra.mxu0 %vm84_vm0, %v5313_v42  ;;  %4562 = vmatprep.subr.mxu0 %v905_v37 }
 0x308   :  { %4559 = vmatprep.mubr.msk.f32.mxu0 %vm84_vm0, %v5317_v43  ;;  %4563 = vmatpush3.msra.mxu0 %v905_v37 }
 0x309   :  { %4564 = vmatprep.subr.mxu0 %v904_v38 }
 0x30a   :  { %4565 = vmatpush3.msra.mxu0 %v904_v38  ;;  %v1064_v38 = vld [vmem:[#allocation5 + $0x10] sm:$0xff] }
 0x30b   :  { %4560 = vmatmul.mubr.msk.f32.gmra.mxu0 %vm84_vm0, %v5323_v44  ;;  %4566 = vmatprep.subr.mxu0 %v903_v39 }
 0x30c   :  { %4567 = vmatpush3.msra.mxu0 %v903_v39  ;;  %v1063_v39 = vld [vmem:[#allocation5 + $0x8] sm:$0xff] }
 0x30d   :  { %4568 = vmatprep.subr.mxu0 %v902_v41 }
 0x30e   :  { %4569 = vmatpush3.msra.mxu0 %v902_v41  ;;  %v1062_v41 = vld [vmem:[#allocation5] sm:$0xff] }
 0x30f   :  { %4570 = vmatprep.subr.mxu0 %v901_v45 }
 0x310   :  { %4571 = vmatpush3.msra.mxu0 %v901_v45 }
 0x311   :  { %4572 = vmatprep.subr.mxu0 %v900_v46 }
 0x312   :  { %4573 = vmatpush3.msra.mxu0 %v900_v46 }
 0x313   :  { %4574 = vmatprep.subr.mxu0 %v899_v47 }
 0x314   :  { %4575 = vmatpush3.msra.mxu0 %v899_v47 }
 0x315   :  { %4576 = vmatprep.subr.mxu0 %v898_v48 }
 0x316   :  { %4577 = vmatpush3.msra.mxu0 %v898_v48 }
 0x317   :  { %4612 = vmatprep.subr.mxu0 %v1065_v36 }
 0x3be   :  { %v4544_v62 = vpop.f32.mrf.mxu1 }
 0x3c0   :  { %v785_v5 = vpop.f32.mrf.mxu1 }
 0x3c2   :  { %v4547_v6 = vpop.f32.mrf.mxu1 }
 0x3c3   :  { %v807_v12 = vadd.f32 %v4547_v6, %v5377_v28  ;;  %v1441_v6 = vld [vmem:[#allocation5 + $0x48] sm:$0xff] }
 0x3c4   :  { %v795_v9 = vpop.f32.mrf.mxu1 }
 0x3c5   :  { %v806_v17 = vadd.f32 %v795_v9, %v607_v11 }
 0x3c7   :  { %v4558_v50 = vpop.f32.mrf.mxu0 }
 0x3c8   :  { %v894_v53 = vsub.f32 %v4558_v50, %v5339_v59 }
 0x3c9   :  { %v874_v51 = vpop.f32.mrf.mxu0 }
 0x3ca   :  { %v893_v52 = vsub.f32 %v874_v51, %v5336_v58  ;;  %v805_v58 = vadd.f32 %v4544_v62, %v5373_v20  ;;  %v1443_v62 = vld [vmem:[#allocation5 + $0x58] sm:$0xff] }
 0x3cb   :  { %v4561_v54 = vpop.f32.mrf.mxu0 }
 0x3cc   :  { %4578 = vmatprep.mubr.msk.f32.mxu0 %vm203_vm1, %v893_v52  ;;  %v896_v60 = vsub.f32 %v4561_v54, %v5342_v61 }
 0x3cd   :  { %v884_v56 = vpop.f32.mrf.mxu0  ;;  %4579 = vmatmul.mubr.msk.f32.vlgmr.msra.gmra.mxu0 %vm203_vm1, %v894_v53 }
 0x3ce   :  { %v895_v57 = vsub.f32 %v884_v56, %v5349_v63  ;;  %v804_v63 = vadd.f32 %v785_v5, %v5375_v24  ;;  %4613 = vmatpush3.msra.mxu0 %v1065_v36  ;;  %v1442_v5 = vld [vmem:[#allocation5 + $0x50] sm:$0xff]  ;;  %v1831_v36 = vld [vmem:[#allocation5 + $0x88] sm:$0xff] }
 0x3cf   :  { %4614 = vmatprep.subr.mxu0 %v1064_v38 }
 0x3d0   :  { %4581 = vmatprep.mubr.msk.f32.mxu0 %vm203_vm1, %v895_v57  ;;  %4615 = vmatpush3.msra.mxu0 %v1064_v38 }
 0x3d1   :  { %4582 = vmatmul.mubr.msk.f32.gmra.mxu0 %vm203_vm1, %v896_v60  ;;  %4616 = vmatprep.subr.mxu0 %v1063_v39 }
 0x3d2   :  { %4617 = vmatpush3.msra.mxu0 %v1063_v39 }
 0x3d3   :  { %4618 = vmatprep.subr.mxu0 %v1062_v41 }
 0x3d4   :  { %4619 = vmatpush3.msra.mxu0 %v1062_v41 }
 0x3d5   :  { %4640 = vmatprep.subr.mxu0 %v1443_v62 }
 0x48d   :  { %v4580_v59 = vpop.f32.mrf.mxu0 }
 0x48e   :  { %v1004_v61 = vadd.f32 %v4580_v59, %v805_v58  ;;  %v1440_v58 = vld [vmem:[#allocation5 + $0x40] sm:$0xff] }
 0x48f   :  { %v984_v10 = vpop.f32.mrf.mxu0 }
 0x490   :  { %v5411_v13 = vadd.f32 %v3967_v7, %v1004_v61  ;;  %v1003_v14 = vadd.f32 %v984_v10, %v804_v63 }
 0x491   :  { %v4583_v15 = vpop.f32.mrf.mxu0 }
 0x492   :  { %v5413_v18 = vadd.f32 %v3967_v7, %v1003_v14  ;;  %v1006_v19 = vadd.f32 %v4583_v15, %v807_v12  ;;  %v3969_v20 = vmul.f32 -1.442695, %v5411_v13 }
 0x493   :  { %v994_v21 = vpop.f32.mrf.mxu0 }
 0x494   :  { %v5416_v55 = vadd.f32 %v3967_v7, %v1006_v19  ;;  %v1005_v16 = vadd.f32 %v994_v21, %v806_v17  ;;  %v3968_v22 = vmul.f32 -1.442695, %v5413_v18  ;;  %5010 = vpow2.f32 %v3969_v20  ;;  %v1638_v19 = vld [vmem:[#allocation5 + $0x78] sm:$0xff]  ;;  %v1637_v20 = vld [vmem:[#allocation5 + $0x70] sm:$0xff]  ;;  %v1636_v21 = vld [vmem:[#allocation5 + $0x68] sm:$0xff] }
 0x496   :  { %v3971_v24 = vmul.f32 -1.442695, %v5416_v55  ;;  %v5420_v26 = vadd.f32 %v3967_v7, %v1005_v16  ;;  %v1635_v16 = vld [vmem:[#allocation5 + $0x60] sm:$0xff] }
 0x498   :  { %5012 = vpow2.f32 %v3971_v24  ;;  %v3970_v28 = vmul.f32 -1.442695, %v5420_v26 }
 0x499   :  { %5014 = vpow2.f32 %v3968_v22 }
 0x49a   :  { %5016 = vpow2.f32 %v3970_v28 }
 0x4a1   :  { %v5011_v29 = vpop.eup %5010 }
 0x4a2   :  { %v1031_v34 = vadd.f32 1.0, %v5011_v29 }
 0x4a5   :  { %v5013_v30 = vpop.eup %5012 }
 0x4a6   :  { %v5015_v31 = vpop.eup %5014  ;;  %v1033_v32 = vadd.f32 1.0, %v5013_v30 }
 0x4a7   :  { %v5017_v33 = vpop.eup %5016  ;;  %v1030_v37 = vadd.f32 1.0, %v5015_v31 }
 0x4a8   :  { %5018 = vrcp.f32 %v1033_v32  ;;  %v1032_v35 = vadd.f32 1.0, %v5017_v33 }
 0x4aa   :  { %5020 = vrcp.f32 %v1032_v35  ;;  %v1832_v35 = vld [vmem:[#allocation5 + $0x90] sm:$0xff] }
 0x4ab   :  { %5022 = vrcp.f32 %v1031_v34  ;;  %v1833_v34 = vld [vmem:[#allocation5 + $0x98] sm:$0xff] }
 0x4ac   :  { %5024 = vrcp.f32 %v1030_v37  ;;  %v1830_v37 = vld [vmem:[#allocation5 + $0x80] sm:$0xff] }
 0x4b5   :  { %v5423_v45 = vpop.eup %5018 }
 0x4b6   :  { %1052 = vrot.lane.b32.xlu0 %v5423_v45, %s5141_s10 }
 0x4b7   :  { %v5427_v46 = vpop.eup %5020 }
 0x4b8   :  { %1050 = vrot.lane.b32.xlu1 %v5427_v46, %s5141_s10  ;;  %v5431_v47 = vpop.eup %5022 }
 0x4b9   :  { %v5435_v48 = vpop.eup %5024 }
 0x4ba   :  { %1048 = vrot.lane.b32.xlu0 %v5431_v47, %s5141_s10 }
 0x4bc   :  { %1046 = vrot.lane.b32.xlu1 %v5435_v48, %s5141_s10 }
 0x528   :  { %v1053_v49 = vpop.permute.xlu0 %1052 }
 0x529   :  { %v5440_v50 = vmul.f32 %v1053_v49, %v5194_v0 }
 0x52a   :  { %v1051_v51 = vpop.permute.xlu1 %1050 }
 0x52b   :  { %v5443_v52 = vmul.f32 %v1051_v51, %v5208_v2  ;;  %4584 = vmatprep.subr.mxu1 %v5440_v50  ;;  %v1155_v2 = vld [vmem:[#allocation5 + $0x38] sm:$0xff] }
 0x52c   :  { %4585 = vmatpush3.msra.mxu1 %v5440_v50  ;;  %v1049_v53 = vpop.permute.xlu0 %1048 }
 0x52d   :  { %v5448_v54 = vmul.f32 %v1049_v53, %v5199_v1  ;;  %4586 = vmatprep.subr.mxu1 %v5443_v52  ;;  %v1154_v1 = vld [vmem:[#allocation5 + $0x30] sm:$0xff] }
 0x52e   :  { %4587 = vmatpush3.msra.mxu1 %v5443_v52  ;;  %v1047_v56 = vpop.permute.xlu1 %1046 }
 0x52f   :  { %v5453_v0 = vmul.f32 %v1047_v56, %v5213_v3  ;;  %4588 = vmatprep.subr.mxu1 %v5448_v54  ;;  %v1153_v3 = vld [vmem:[#allocation5 + $0x28] sm:$0xff] }
 0x530   :  { %4589 = vmatpush3.msra.mxu1 %v5448_v54 }
 0x531   :  { %4590 = vmatprep.subr.mxu1 %v5453_v0  ;;  %4620 = vmatprep.mubr.msk.f32.mxu0 %vm84_vm0, %v5453_v0 }
 0x532   :  { %4591 = vmatpush3.msra.mxu1 %v5453_v0  ;;  %4621 = vmatmul.mubr.msk.f32.vlgmr.msra.gmra.mxu0 %vm84_vm0, %v5448_v54 }
 0x533   :  { %4593 = vmatmul.mubr.msk.f32.vlgmr.msra.gmra.mxu1 %vm84_vm0, %v5259_v23  ;;  %4623 = vmatprep.mubr.msk.f32.mxu0 %vm84_vm0, %v5443_v52  ;;  %v1152_v23 = vld [vmem:[#allocation5 + $0x20] sm:$0xff] }
 0x534   :  { %4595 = vmatprep.mubr.msk.f32.mxu1 %vm84_vm0, %v5265_v25  ;;  %4598 = vmatprep.subr.mxu1 %v1155_v2 }
 0x535   :  { %4599 = vmatpush3.msra.mxu1 %v1155_v2  ;;  %4641 = vmatpush3.msra.mxu0 %v1443_v62 }
 0x536   :  { %4624 = vmatmul.mubr.msk.f32.gmra.mxu0 %vm84_vm0, %v5440_v50  ;;  %4600 = vmatprep.subr.mxu1 %v1154_v1 }
 0x537   :  { %4596 = vmatmul.mubr.msk.f32.gmra.mxu1 %vm84_vm0, %v5275_v27  ;;  %4642 = vmatprep.subr.mxu0 %v1442_v5 }
 0x538   :  { %4601 = vmatpush3.msra.mxu1 %v1154_v1  ;;  %4643 = vmatpush3.msra.mxu0 %v1442_v5 }
 0x539   :  { %4602 = vmatprep.subr.mxu1 %v1153_v3  ;;  %4644 = vmatprep.subr.mxu0 %v1441_v6 }
 0x53a   :  { %4603 = vmatpush3.msra.mxu1 %v1153_v3  ;;  %4645 = vmatpush3.msra.mxu0 %v1441_v6 }
 0x53b   :  { %4604 = vmatprep.subr.mxu1 %v1152_v23  ;;  %4646 = vmatprep.subr.mxu0 %v1440_v58 }
 0x53c   :  { %4605 = vmatpush3.msra.mxu1 %v1152_v23  ;;  %4647 = vmatpush3.msra.mxu0 %v1440_v58 }
 0x53d   :  { %4668 = vmatprep.subr.mxu0 %v1638_v19 }
 0x5f2   :  { %v4622_v53 = vpop.f32.mrf.mxu0 }
 0x5f3   :  { %v5473_v57 = vpop.f32.mrf.mxu1 }
 0x5f5   :  { %v5475_v60 = vpop.f32.mrf.mxu1 }
 0x5f6   :  { %4606 = vmatprep.mubr.msk.f32.mxu1 %vm84_vm0, %v5475_v60 }
 0x5f7   :  { %v5479_v25 = vpop.f32.mrf.mxu1  ;;  %4607 = vmatmul.mubr.msk.f32.vlgmr.msra.gmra.mxu1 %vm84_vm0, %v5473_v57 }
 0x5f8   :  { %4626 = vmatprep.subr.mxu1 %v5479_v25 }
 0x5f9   :  { %v5484_v27 = vpop.f32.mrf.mxu1  ;;  %4627 = vmatpush3.msra.mxu1 %v5479_v25 }
 0x5fa   :  { %4609 = vmatprep.mubr.msk.f32.mxu1 %vm84_vm0, %v5484_v27  ;;  %4628 = vmatprep.subr.mxu1 %v5484_v27 }
 0x5fb   :  { %4610 = vmatmul.mubr.msk.f32.gmra.mxu1 %vm84_vm0, %v5479_v25 }
 0x5fc   :  { %4629 = vmatpush3.msra.mxu1 %v5484_v27  ;;  %4634 = vmatprep.mubr.msk.f32.mxu1 %vm84_vm0, %v5298_v40 }
 0x5fd   :  { %4630 = vmatprep.subr.mxu1 %v5473_v57 }
 0x5fe   :  { %4631 = vmatpush3.msra.mxu1 %v5473_v57 }
 0x5ff   :  { %4632 = vmatprep.subr.mxu1 %v5475_v60 }
 0x600   :  { %4633 = vmatpush3.msra.mxu1 %v5475_v60 }
 0x601   :  { %4635 = vmatmul.mubr.msk.f32.vlgmr.msra.gmra.mxu1 %vm84_vm0, %v5313_v42 }
 0x602   :  { %4637 = vmatprep.mubr.msk.f32.mxu1 %vm84_vm0, %v5317_v43 }
 0x605   :  { %4638 = vmatmul.mubr.msk.f32.gmra.mxu1 %vm84_vm0, %v5323_v44 }
 0x606   :  { %4662 = vmatprep.mubr.msk.f32.mxu1 %vm84_vm0, %v5298_v40 }
 0x6b7   :  { %v5507_v59 = vpop.f32.mrf.mxu1 }
 0x6b9   :  { %v5509_v7 = vpop.f32.mrf.mxu1 }
 0x6bb   :  { %v5511_v8 = vpop.f32.mrf.mxu1 }
 0x6bd   :  { %v5513_v63 = vpop.f32.mrf.mxu1 }
 0x6c1   :  { %v4636_v61 = vpop.f32.mrf.mxu1 }
 0x6c2   :  { %v5519_v11 = vsub.f32 %v4636_v61, %v5448_v54  ;;  %v1331_v54 = vpop.f32.mrf.mxu0 }
 0x6c3   :  { %v1416_v9 = vpop.f32.mrf.mxu1 }
 0x6c4   :  { %v5516_v10 = vsub.f32 %v1416_v9, %v5453_v0  ;;  %v4625_v56 = vpop.f32.mrf.mxu0  ;;  %v1337_v9 = vadd.f32 %v4622_v53, %v5507_v59  ;;  %v5058_v53 = vld [vmem:[%s6016_s2 + $0x18] sm:$0xff] }
 0x6c5   :  { %v4639_v12 = vpop.f32.mrf.mxu1  ;;  %v1347_v62 = vadd.f32 %v4625_v56, %v5511_v8 }
 0x6c6   :  { %v5522_v14 = vsub.f32 %v4639_v12, %v5440_v50  ;;  %4648 = vmatprep.mubr.msk.f32.mxu0 %vm84_vm0, %v5516_v10  ;;  %v1341_v0 = vpop.f32.mrf.mxu0 }
 0x6c7   :  { %v1426_v15 = vpop.f32.mrf.mxu1  ;;  %4649 = vmatmul.mubr.msk.f32.vlgmr.msra.gmra.mxu0 %vm84_vm0, %v5519_v11  ;;  %v1342_v6 = vadd.f32 %v1341_v0, %v5513_v63  ;;  %v1965_v0 = vsub.f32 1.0, %v5427_v46 }
 0x6c8   :  { %v5529_v17 = vsub.f32 %v1426_v15, %v5443_v52  ;;  %4654 = vmatprep.subr.mxu1 %v5522_v14  ;;  %4669 = vmatpush3.msra.mxu0 %v1638_v19 }
 0x6c9   :  { %4655 = vmatpush3.msra.mxu1 %v5522_v14  ;;  %4670 = vmatprep.subr.mxu0 %v1637_v20 }
 0x6ca   :  { %4651 = vmatprep.mubr.msk.f32.mxu0 %vm84_vm0, %v5529_v17  ;;  %4656 = vmatprep.subr.mxu1 %v5529_v17 }
 0x6cb   :  { %4652 = vmatmul.mubr.msk.f32.gmra.mxu0 %vm84_vm0, %v5522_v14  ;;  %4657 = vmatpush3.msra.mxu1 %v5529_v17 }
 0x6cc   :  { %4658 = vmatprep.subr.mxu1 %v5519_v11  ;;  %4671 = vmatpush3.msra.mxu0 %v1637_v20 }
 0x6cd   :  { %4659 = vmatpush3.msra.mxu1 %v5519_v11  ;;  %4672 = vmatprep.subr.mxu0 %v1636_v21 }
 0x6ce   :  { %4660 = vmatprep.subr.mxu1 %v5516_v10  ;;  %4673 = vmatpush3.msra.mxu0 %v1636_v21 }
 0x6cf   :  { %4661 = vmatpush3.msra.mxu1 %v5516_v10  ;;  %4674 = vmatprep.subr.mxu0 %v1635_v16 }
 0x6d0   :  { %4663 = vmatmul.mubr.msk.f32.vlgmr.msra.gmra.mxu1 %vm84_vm0, %v5313_v42  ;;  %4675 = vmatpush3.msra.mxu0 %v1635_v16 }
 0x6d1   :  { %4665 = vmatprep.mubr.msk.f32.mxu1 %vm84_vm0, %v5317_v43  ;;  %4696 = vmatprep.subr.mxu0 %v1833_v34 }
 0x6d4   :  { %4666 = vmatmul.mubr.msk.f32.gmra.mxu1 %vm84_vm0, %v5323_v44 }
 0x6d5   :  { %4690 = vmatprep.mubr.msk.f32.mxu1 %vm84_vm0, %v5298_v40 }
 0x787   :  { %v4650_v2 = vpop.f32.mrf.mxu0 }
 0x788   :  { %v1542_v15 = vadd.f32 %v4650_v2, %v1337_v9 }
 0x789   :  { %v1522_v1 = vpop.f32.mrf.mxu0 }
 0x78b   :  { %v4653_v3 = vpop.f32.mrf.mxu0 }
 0x78c   :  { %v1544_v58 = vadd.f32 %v4653_v3, %v1347_v62  ;;  %v5059_v3 = vld [vmem:[%s6016_s2 + $0x10] sm:$0xff] }
 0x78d   :  { %v1532_v23 = vpop.f32.mrf.mxu0 }
 0x790   :  { %v4664_v22 = vpop.f32.mrf.mxu1 }
 0x791   :  { %v1631_v29 = vsub.f32 %v4664_v22, %v5473_v57 }
 0x792   :  { %v1611_v24 = vpop.f32.mrf.mxu1 }
 0x793   :  { %v1630_v28 = vsub.f32 %v1611_v24, %v5475_v60 }
 0x794   :  { %v4667_v30 = vpop.f32.mrf.mxu1 }
 0x795   :  { %v1633_v31 = vsub.f32 %v4667_v30, %v5479_v25  ;;  %4676 = vmatprep.mubr.msk.f32.mxu0 %vm84_vm0, %v1630_v28 }
 0x796   :  { %v1621_v32 = vpop.f32.mrf.mxu1  ;;  %4677 = vmatmul.mubr.msk.f32.vlgmr.msra.gmra.mxu0 %vm84_vm0, %v1631_v29 }
 0x797   :  { %v1632_v33 = vsub.f32 %v1621_v32, %v5484_v27  ;;  %4682 = vmatprep.subr.mxu1 %v1633_v31  ;;  %4697 = vmatpush3.msra.mxu0 %v1833_v34 }
 0x798   :  { %4683 = vmatpush3.msra.mxu1 %v1633_v31  ;;  %4698 = vmatprep.subr.mxu0 %v1832_v35 }
 0x799   :  { %4679 = vmatprep.mubr.msk.f32.mxu0 %vm84_vm0, %v1632_v33  ;;  %4684 = vmatprep.subr.mxu1 %v1632_v33 }
 0x79a   :  { %4680 = vmatmul.mubr.msk.f32.gmra.mxu0 %vm84_vm0, %v1633_v31  ;;  %4685 = vmatpush3.msra.mxu1 %v1632_v33 }
 0x79b   :  { %4686 = vmatprep.subr.mxu1 %v1631_v29  ;;  %4699 = vmatpush3.msra.mxu0 %v1832_v35 }
 0x79c   :  { %4687 = vmatpush3.msra.mxu1 %v1631_v29  ;;  %4700 = vmatprep.subr.mxu0 %v1831_v36 }
 0x79d   :  { %4688 = vmatprep.subr.mxu1 %v1630_v28  ;;  %4701 = vmatpush3.msra.mxu0 %v1831_v36 }
 0x79e   :  { %4689 = vmatpush3.msra.mxu1 %v1630_v28  ;;  %4702 = vmatprep.subr.mxu0 %v1830_v37 }
 0x79f   :  { %4691 = vmatmul.mubr.msk.f32.vlgmr.msra.gmra.mxu1 %vm84_vm0, %v5313_v42  ;;  %4703 = vmatpush3.msra.mxu0 %v1830_v37  ;;  %v5613_v37 = vld [vmem:[%s6016_s2 + $0x20] sm:$0xff] }
 0x7a0   :  { %4693 = vmatprep.mubr.msk.f32.mxu1 %vm84_vm0, %v5317_v43 }
 0x7a3   :  { %4694 = vmatmul.mubr.msk.f32.gmra.mxu1 %vm84_vm0, %v5323_v44 }
 0x7a4   :  { %4718 = vmatprep.mubr.msk.f32.mxu1 %vm84_vm0, %v5218_v4 }
 0x856   :  { %v4678_v57 = vpop.f32.mrf.mxu0 }
 0x857   :  { %v1737_v16 = vadd.f32 %v4678_v57, %v1542_v15 }
 0x858   :  { %v1717_v60 = vpop.f32.mrf.mxu0 }
 0x85a   :  { %v4681_v25 = vpop.f32.mrf.mxu0 }
 0x85c   :  { %v1727_v27 = vpop.f32.mrf.mxu0 }
 0x85f   :  { %v4692_v38 = vpop.f32.mrf.mxu1 }
 0x860   :  { %v1826_v49 = vsub.f32 %v4692_v38, %v5519_v11  ;;  %v1739_v11 = vadd.f32 %v4681_v25, %v1544_v58  ;;  %v2126_v38 = vld [vmem:[#allocation2 + $0x1b8] sm:$0xff]  ;;  %v5060_v25 = vld [vmem:[%s6016_s2 + $0x8] sm:$0xff]  ;;  %v1963_v58 = vsub.f32 1.0, %v5435_v48 }
 0x861   :  { %v1806_v39 = vpop.f32.mrf.mxu1  ;;  %4724 = vmatprep.subr.mxu0 %v2126_v38 }
 0x862   :  { %v1825_v41 = vsub.f32 %v1806_v39, %v5516_v10  ;;  %v1543_v10 = vadd.f32 %v1532_v23, %v1342_v6  ;;  %v2125_v39 = vld [vmem:[#allocation2 + $0x1b0] sm:$0xff]  ;;  %v1961_v23 = vmul.f32 %v5059_v3, %v5427_v46 }
 0x863   :  { %v4695_v50 = vpop.f32.mrf.mxu1 }
 0x864   :  { %4704 = vmatprep.mubr.msk.f32.mxu0 %vm84_vm0, %v1825_v41  ;;  %v1828_v52 = vsub.f32 %v4695_v50, %v5522_v14  ;;  %v1332_v14 = vadd.f32 %v1331_v54, %v5509_v7  ;;  %v2124_v41 = vld [vmem:[#allocation2 + $0x1a8] sm:$0xff]  ;;  %v2122_v50 = vld [vmem:[#allocation2 + $0x198] sm:$0xff]  ;;  %v1962_v54 = vmul.f32 %v5058_v53, %v5423_v45  ;;  %v2413_v53 = vld [vmem:[#allocation2 + $0x1d0] sm:$0xff] }
 0x865   :  { %v1816_v4 = vpop.f32.mrf.mxu1  ;;  %4705 = vmatmul.mubr.msk.f32.vlgmr.msra.gmra.mxu0 %vm84_vm0, %v1826_v49  ;;  %v2123_v49 = vld [vmem:[#allocation2 + $0x1a0] sm:$0xff] }
 0x866   :  { %v1827_v51 = vsub.f32 %v1816_v4, %v5529_v17  ;;  %v1738_v17 = vadd.f32 %v1727_v27, %v1543_v10  ;;  %v1541_v21 = vadd.f32 %v1522_v1, %v1332_v14  ;;  %4725 = vmatpush3.msra.mxu0 %v2126_v38  ;;  %v2121_v4 = vld [vmem:[#allocation2 + $0x190] sm:$0xff]  ;;  %v5061_v10 = vld [vmem:[%s6016_s2] sm:$0xff] }
 0x867   :  { %4726 = vmatprep.subr.mxu0 %v2125_v39 }
 0x868   :  { %4707 = vmatprep.mubr.msk.f32.mxu0 %vm84_vm0, %v1827_v51  ;;  %v1736_v8 = vadd.f32 %v1717_v60, %v1541_v21  ;;  %4727 = vmatpush3.msra.mxu0 %v2125_v39  ;;  %v1966_v51 = vsub.f32 1.0, %v5423_v45  ;;  %v1964_v60 = vsub.f32 1.0, %v5431_v47  ;;  %v1960_v45 = vmul.f32 %v5060_v25, %v5431_v47 }
 0x869   :  { %4708 = vmatmul.mubr.msk.f32.gmra.mxu0 %vm84_vm0, %v1828_v52  ;;  %4728 = vmatprep.subr.mxu0 %v2124_v41 }
 0x86a   :  { %4729 = vmatpush3.msra.mxu0 %v2124_v41 }
 0x86b   :  { %4730 = vmatprep.subr.mxu0 %v2123_v49 }
 0x86c   :  { %4731 = vmatpush3.msra.mxu0 %v2123_v49 }
 0x86d   :  { %4732 = vmatprep.subr.mxu0 %v2122_v50 }
 0x86e   :  { %4733 = vmatpush3.msra.mxu0 %v2122_v50  ;;  %v2417_v50 = vld [vmem:[#allocation2 + $0x1f0] sm:$0xff] }
 0x86f   :  { %4734 = vmatprep.subr.mxu0 %v2121_v4 }
 0x870   :  { %4735 = vmatpush3.msra.mxu0 %v2121_v4  ;;  %v2416_v4 = vld [vmem:[#allocation2 + $0x1e8] sm:$0xff] }
 0x925   :  { %v4706_v5 = vpop.f32.mrf.mxu0 }
 0x926   :  { %v1932_v63 = vadd.f32 %v4706_v5, %v1737_v16 }
 0x927   :  { %v1912_v61 = vpop.f32.mrf.mxu0 }
 0x928   :  { %v1931_v59 = vadd.f32 %v1912_v61, %v1736_v8 }
 0x929   :  { %v4709_v12 = vpop.f32.mrf.mxu0 }
 0x92a   :  { %v1934_v19 = vadd.f32 %v4709_v12, %v1739_v11  ;;  %v1959_v11 = vmul.f32 %v5061_v10, %v5435_v48  ;;  %v2612_v10 = vld [vmem:[#allocation2 + $0x210] sm:$0xff] }
 0x92b   :  { %v1922_v20 = vpop.f32.mrf.mxu0 }
 0x92c   :  { %v1933_v22 = vadd.f32 %v1922_v20, %v1738_v17  ;;  %1945 = vrot.lane.b32.xlu0 %v1934_v19, %s5142_s11 }
 0x92e   :  { %1943 = vrot.lane.b32.xlu1 %v1933_v22, %s5142_s11 }
 0x930   :  { %1941 = vrot.lane.b32.xlu0 %v1932_v63, %s5142_s11  ;;  %v2032_v63 = vld [vmem:[#allocation2 + $0x178] sm:$0xff] }
 0x932   :  { %1939 = vrot.lane.b32.xlu1 %v1931_v59, %s5142_s11  ;;  %v2031_v59 = vld [vmem:[#allocation2 + $0x170] sm:$0xff] }
 0x99e   :  { %v1946_v7 = vpop.permute.xlu0 %1945 }
 0x99f   :  { %v1954_v24 = vadd.f32 %v1946_v7, %v5416_v55  ;;  %v5666_v7 = vld [vmem:[%s6014_s0 + $0x8] sm:$0xff] }
 0x9a0   :  { %v1944_v28 = vpop.permute.xlu1 %1943 }
 0x9a1   :  { %5026 = vtanh.f32 %v1954_v24  ;;  %v1953_v29 = vadd.f32 %v1944_v28, %v5420_v26  ;;  %v5593_v26 = vld [vmem:[%s6016_s2 + $0x38] sm:$0xff]  ;;  %v5673_v24 = vld [vmem:[%s6014_s0 + $0x10] sm:$0xff]  ;;  %v2030_v28 = vld [vmem:[#allocation2 + $0x168] sm:$0xff] }
 0x9a2   :  { %v1942_v30 = vpop.permute.xlu0 %1941 }
 0x9a3   :  { %5028 = vtanh.f32 %v1953_v29  ;;  %v1952_v31 = vadd.f32 %v1942_v30, %v5411_v13  ;;  %v5599_v13 = vld [vmem:[%s6016_s2 + $0x30] sm:$0xff]  ;;  %v2029_v29 = vld [vmem:[#allocation2 + $0x160] sm:$0xff]  ;;  %v5680_v30 = vld [vmem:[%s6014_s0 + $0x18] sm:$0xff] }
 0x9a4   :  { %v1940_v32 = vpop.permute.xlu1 %1939 }
 0x9a5   :  { %5030 = vtanh.f32 %v1952_v31  ;;  %v1951_v33 = vadd.f32 %v1940_v32, %v5413_v18  ;;  %v5606_v18 = vld [vmem:[%s6016_s2 + $0x28] sm:$0xff]  ;;  %v2028_v31 = vld [vmem:[#allocation2 + $0x158] sm:$0xff]  ;;  %v2027_v32 = vld [vmem:[#allocation2 + $0x150] sm:$0xff] }
 0x9a7   :  { %5032 = vtanh.f32 %v1951_v33  ;;  %v2026_v33 = vld [vmem:[#allocation2 + $0x148] sm:$0xff] }
 0x9ae   :  { %v5027_v34 = vpop.eup %5026 }
 0x9af   :  { %1977 = vrot.lane.b32.xlu0 %v5027_v34, %s5142_s11  ;;  %v2025_v34 = vld [vmem:[#allocation2 + $0x140] sm:$0xff] }
 0x9b0   :  { %v5029_v35 = vpop.eup %5028 }
 0x9b1   :  { %1975 = vrot.lane.b32.xlu1 %v5029_v35, %s5142_s11  ;;  %v2120_v35 = vld [vmem:[#allocation2 + $0x188] sm:$0xff] }
 0x9b2   :  { %v5031_v55 = vpop.eup %5030  ;;  %4736 = vmatprep.subr.mxu0 %v2120_v35 }
 0x9b3   :  { %1973 = vrot.lane.b32.xlu0 %v5031_v55, %s5142_s11  ;;  %4737 = vmatpush3.msra.mxu0 %v2120_v35  ;;  %v2119_v55 = vld [vmem:[#allocation2 + $0x180] sm:$0xff] }
 0x9b4   :  { %v5033_v36 = vpop.eup %5032  ;;  %4738 = vmatprep.subr.mxu0 %v2119_v55 }
 0x9b5   :  { %1971 = vrot.lane.b32.xlu1 %v5033_v36, %s5142_s11  ;;  %4739 = vmatpush3.msra.mxu0 %v2119_v55  ;;  %v2418_v36 = vld [vmem:[#allocation2 + $0x1f8] sm:$0xff] }
 0x9b7   :  { %2014 = vrot.lane.b32.xlu0 %v5593_v26, %s5140_s12 }
 0x9b9   :  { %2012 = vrot.lane.b32.xlu1 %v5599_v13, %s5140_s12 }
 0x9bb   :  { %2010 = vrot.lane.b32.xlu0 %v5606_v18, %s5140_s12 }
 0x9bd   :  { %2008 = vrot.lane.b32.xlu1 %v5613_v37, %s5140_s12  ;;  %s3918_s12 = sshll.u32 %s5143_s19, 4  ;;  %s3919_s12 = int_to_ptr.vmem [resolvable:$true] %s3918_s12 }
 0x9be   :  { %s5110_s20 = scalar_lea.vmem %s3919_s12, 1024  ;;  %p5115_p11 = scmp.lt.s32.totalorder %s3919_s12, %s3919_s12 }
 0x9bf   :  { %p5111_p10 = scmp.ne.s32.totalorder %s3919_s12, %s5110_s20  ;;  %p5116_p12 = scmp.lt.s32.totalorder %s5110_s20, %s5110_s20 }
 0x9c1   :  { %p5117_p13 = por %p5116_p12, %p5115_p11 }
 0x9c3   :  { %p5118_p0 = pnand %p5117_p13, %p5111_p10 }
 0xa21   :  { %v1978_v52 = vpop.permute.xlu0 %1977 }
 0xa22   :  { %v1986_v56 = vmul.f32 %v1978_v52, %v1966_v51  ;;  %v2415_v51 = vld [vmem:[#allocation2 + $0x1e0] sm:$0xff]  ;;  %v2414_v52 = vld [vmem:[#allocation2 + $0x1d8] sm:$0xff] }
 0xa23   :  { %v1976_v2 = vpop.permute.xlu1 %1975 }
 0xa24   :  { %v1990_v1 = vadd.f32 %v1986_v56, %v1962_v54  ;;  %v1985_v57 = vmul.f32 %v1976_v2, %v1965_v0  ;;  %v2412_v54 = vld [vmem:[#allocation2 + $0x1c8] sm:$0xff]  ;;  %v2411_v56 = vld [vmem:[#allocation2 + $0x1c0] sm:$0xff] }
 0xa25   :  { %v1974_v27 = vpop.permute.xlu0 %1973 }
 0xa26   :  { %v1994_v62 = vmax.f32 %v1990_v1, 0.0  ;;  %v1989_v5 = vadd.f32 %v1985_v57, %v1961_v23  ;;  %v1984_v6 = vmul.f32 %v1974_v27, %v1964_v60 }
 0xa27   :  { %v1972_v61 = vpop.permute.xlu1 %1971 }
 0xa28   :  { %1998 = vst.msk [vmem:[#allocation7 + $0x18] sm:$0xff] %vm84_vm0, %v1994_v62  ;;  %v1993_v9 = vmax.f32 %v1989_v5, 0.0  ;;  %v1988_v46 = vadd.f32 %v1984_v6, %v1960_v45  ;;  %v1983_v12 = vmul.f32 %v1972_v61, %v1963_v58  ;;  %v2617_v6 = vld [vmem:[#allocation2 + $0x238] sm:$0xff]  ;;  %v2616_v58 = vld [vmem:[#allocation2 + $0x230] sm:$0xff]  ;;  %v2615_v61 = vld [vmem:[#allocation2 + $0x228] sm:$0xff] }
 0xa29   :  { %v2015_v14 = vpop.permute.xlu0 %2014 }
 0xa2a   :  { %1997 = vst.msk [vmem:[#allocation7 + $0x10] sm:$0xff] %vm84_vm0, %v1993_v9  ;;  %v1992_v47 = vmax.f32 %v1988_v46, 0.0  ;;  %v1987_v15 = vadd.f32 %v1983_v12, %v1959_v11  ;;  %v5642_v17 = vsel %vm84_vm0, %v1994_v62, %v2015_v14  ;;  %v2613_v46 = vld [vmem:[#allocation2 + $0x218] sm:$0xff]  ;;  %v2611_v11 = vld [vmem:[#allocation2 + $0x208] sm:$0xff]  ;;  %v2610_v12 = vld [vmem:[#allocation2 + $0x200] sm:$0xff] }
 0xa2b   :  { %4710 = vmatprep.subr.mxu1 %v5642_v17  ;;  %v2013_v19 = vpop.permute.xlu1 %2012 }
 0xa2c   :  { %1996 = vst.msk [vmem:[#allocation7 + $0x8] sm:$0xff] %vm84_vm0, %v1992_v47  ;;  %v1991_v20 = vmax.f32 %v1987_v15, 0.0  ;;  %v5647_v21 = vsel %vm84_vm0, %v1993_v9, %v2013_v19  ;;  %4711 = vmatpush3.msra.mxu1 %v5642_v17  ;;  %v2614_v9 = vld [vmem:[#allocation2 + $0x220] sm:$0xff] }
 0xa2d   :  { %v2011_v48 = vpop.permute.xlu0 %2010  ;;  %4712 = vmatprep.subr.mxu1 %v5647_v21 }
 0xa2e   :  { %1995 = vst.msk [vmem:[#allocation7] sm:$0xff] %vm84_vm0, %v1991_v20  ;;  %v5653_v16 = vsel %vm84_vm0, %v1992_v47, %v2011_v48  ;;  %4713 = vmatpush3.msra.mxu1 %v5647_v21 }
 0xa2f   :  { %v2009_v22 = vpop.permute.xlu1 %2008  ;;  %4714 = vmatprep.subr.mxu1 %v5653_v16 }
 0xa30   :  { %v5658_v8 = vsel %vm84_vm0, %v1991_v20, %v2009_v22  ;;  %4715 = vmatpush3.msra.mxu1 %v5653_v16 }
 0xa31   :  { %4716 = vmatprep.subr.mxu1 %v5658_v8 }
 0xa32   :  { %4717 = vmatpush3.msra.mxu1 %v5658_v8 }
 0xa33   :  { %4719 = vmatmul.mubr.msk.f32.vlgmr.msra.gmra.mxu1 %vm84_vm0, %v5666_v7  ;;  %4746 = vmatprep.subr.mxu1 %v2032_v63 }
 0xa34   :  { %4747 = vmatpush3.msra.mxu1 %v2032_v63  ;;  %4721 = vmatprep.mubr.msk.f32.mxu1 %vm84_vm0, %v5673_v24 }
 0xa35   :  { %4748 = vmatprep.subr.mxu1 %v2031_v59 }
 0xa36   :  { %4749 = vmatpush3.msra.mxu1 %v2031_v59 }
 0xa37   :  { %4722 = vmatmul.mubr.msk.f32.gmra.mxu1 %vm84_vm0, %v5680_v30  ;;  %4750 = vmatprep.subr.mxu1 %v2030_v28 }
 0xa38   :  { %4751 = vmatpush3.msra.mxu1 %v2030_v28  ;;  %4762 = vmatprep.mubr.msk.f32.mxu1 %vm203_vm1, %v5658_v8 }
 0xa39   :  { %4752 = vmatprep.subr.mxu1 %v2029_v29 }
 0xa3a   :  { %4753 = vmatpush3.msra.mxu1 %v2029_v29 }
 0xa3b   :  { %4754 = vmatprep.subr.mxu1 %v2028_v31 }
 0xa3c   :  { %4755 = vmatpush3.msra.mxu1 %v2028_v31 }
 0xa3d   :  { %4756 = vmatprep.subr.mxu1 %v2027_v32 }
 0xa3e   :  { %4757 = vmatpush3.msra.mxu1 %v2027_v32 }
 0xa3f   :  { %4758 = vmatprep.subr.mxu1 %v2026_v33 }
 0xa40   :  { %4759 = vmatpush3.msra.mxu1 %v2026_v33 }
 0xa41   :  { %4760 = vmatprep.subr.mxu1 %v2025_v34 }
 0xa42   :  { %4761 = vmatpush3.msra.mxu1 %v2025_v34 }
 0xa43   :  { %4763 = vmatmul.mubr.msk.f32.vlgmr.msra.gmra.mxu1 %vm203_vm1, %v5653_v16  ;;  %4782 = vmatprep.subr.mxu1 %v2418_v36 }
 0xa44   :  { %4765 = vmatprep.mubr.msk.f32.mxu1 %vm203_vm1, %v5647_v21  ;;  %4783 = vmatpush3.msra.mxu1 %v2418_v36  ;;  %v5065_v36 = vld [vmem:[%s6014_s0] sm:$0xff] }
 0xa45   :  { %4784 = vmatprep.subr.mxu1 %v2417_v50 }
 0xa46   :  { %4785 = vmatpush3.msra.mxu1 %v2417_v50  ;;  %v2812_v50 = vld [vmem:[#allocation2 + $0x258] sm:$0xff] }
 0xa47   :  { %4766 = vmatmul.mubr.msk.f32.gmra.mxu1 %vm203_vm1, %v5642_v17  ;;  %4786 = vmatprep.subr.mxu1 %v2416_v4 }
 0xa48   :  { %4787 = vmatpush3.msra.mxu1 %v2416_v4  ;;  %v2811_v4 = vld [vmem:[#allocation2 + $0x250] sm:$0xff] }
 0xa49   :  { %4788 = vmatprep.subr.mxu1 %v2415_v51 }
 0xa4a   :  { %4789 = vmatpush3.msra.mxu1 %v2415_v51  ;;  %v2810_v51 = vld [vmem:[#allocation2 + $0x248] sm:$0xff] }
 0xa4b   :  { %4790 = vmatprep.subr.mxu1 %v2414_v52 }
 0xa4c   :  { %4791 = vmatpush3.msra.mxu1 %v2414_v52  ;;  %v2809_v52 = vld [vmem:[#allocation2 + $0x240] sm:$0xff] }
 0xa4d   :  { %4792 = vmatprep.subr.mxu1 %v2413_v53 }
 0xa4e   :  { %4793 = vmatpush3.msra.mxu1 %v2413_v53 }
 0xa4f   :  { %4794 = vmatprep.subr.mxu1 %v2412_v54 }
 0xa50   :  { %4795 = vmatpush3.msra.mxu1 %v2412_v54 }
 0xa51   :  { %4796 = vmatprep.subr.mxu1 %v2411_v56 }
 0xa52   :  { %4797 = vmatpush3.msra.mxu1 %v2411_v56 }
 0xaf3   :  { %v5692_v38 = vpop.f32.mrf.mxu1 }
 0xaf5   :  { %v5694_v39 = vpop.f32.mrf.mxu1 }
 0xaf6   :  { %4740 = vmatprep.mubr.msk.f32.mxu0 %vm203_vm1, %v5694_v39 }
 0xaf7   :  { %v5698_v41 = vpop.f32.mrf.mxu1  ;;  %4741 = vmatmul.mubr.msk.f32.vlgmr.msra.gmra.mxu0 %vm203_vm1, %v5692_v38 }
 0xaf8   :  { %4768 = vmatprep.subr.mxu0 %v5698_v41 }
 0xaf9   :  { %v5703_v49 = vpop.f32.mrf.mxu1  ;;  %4769 = vmatpush3.msra.mxu0 %v5698_v41 }
 0xafa   :  { %4743 = vmatprep.mubr.msk.f32.mxu0 %vm203_vm1, %v5703_v49  ;;  %4770 = vmatprep.subr.mxu0 %v5703_v49 }
 0xafb   :  { %4744 = vmatmul.mubr.msk.f32.gmra.mxu0 %vm203_vm1, %v5698_v41 }
 0xafc   :  { %4771 = vmatpush3.msra.mxu0 %v5703_v49  ;;  %4776 = vmatprep.mubr.msk.f32.mxu0 %vm84_vm0, %v5298_v40 }
 0xafd   :  { %4772 = vmatprep.subr.mxu0 %v5692_v38 }
 0xafe   :  { %4773 = vmatpush3.msra.mxu0 %v5692_v38 }
 0xaff   :  { %4774 = vmatprep.subr.mxu0 %v5694_v39 }
 0xb00   :  { %4775 = vmatpush3.msra.mxu0 %v5694_v39 }
 0xb01   :  { %4777 = vmatmul.mubr.msk.f32.vlgmr.msra.gmra.mxu0 %vm84_vm0, %v5313_v42 }
 0xb02   :  { %4779 = vmatprep.mubr.msk.f32.mxu0 %vm84_vm0, %v5317_v43 }
 0xb03   :  { %v4764_v14 = vpop.f32.mrf.mxu1 }
 0xb05   :  { %4780 = vmatmul.mubr.msk.f32.gmra.mxu0 %vm84_vm0, %v5323_v44  ;;  %v2302_v47 = vpop.f32.mrf.mxu1 }
 0xb06   :  { %4812 = vmatprep.mubr.msk.f32.mxu0 %vm84_vm0, %v5298_v40 }
 0xb07   :  { %v4767_v15 = vpop.f32.mrf.mxu1 }
 0xbb7   :  { %v4742_v0 = vpop.f32.mrf.mxu0 }
 0xbb8   :  { %v2308_v19 = vadd.f32 %v4764_v14, %v4742_v0 }
 0xbb9   :  { %v2205_v2 = vpop.f32.mrf.mxu0 }
 0xbbb   :  { %v4745_v1 = vpop.f32.mrf.mxu0 }
 0xbbc   :  { %v2318_v22 = vadd.f32 %v4767_v15, %v4745_v1 }
 0xbbd   :  { %v5726_v3 = vpop.f32.mrf.mxu0 }
 0xbc1   :  { %v4778_v23 = vpop.f32.mrf.mxu0 }
 0xbc2   :  { %v5732_v25 = vsub.f32 %v4778_v23, %v5653_v16 }
 0xbc3   :  { %v2387_v57 = vpop.f32.mrf.mxu0 }
 0xbc4   :  { %v5729_v60 = vsub.f32 %v2387_v57, %v5658_v8 }
 0xbc5   :  { %v4781_v45 = vpop.f32.mrf.mxu0 }
 0xbc6   :  { %v5735_v27 = vsub.f32 %v4781_v45, %v5642_v17  ;;  %4798 = vmatprep.mubr.msk.f32.mxu1 %vm203_vm1, %v5729_v60  ;;  %v5764_v17 = vpop.f32.mrf.mxu1 }
 0xbc7   :  { %v2397_v62 = vpop.f32.mrf.mxu0  ;;  %4799 = vmatmul.mubr.msk.f32.vlgmr.msra.gmra.mxu1 %vm203_vm1, %v5732_v25 }
 0xbc8   :  { %v5742_v5 = vsub.f32 %v2397_v62, %v5647_v21  ;;  %4804 = vmatprep.subr.mxu0 %v5735_v27  ;;  %v2303_v21 = vadd.f32 %v2302_v47, %v2205_v2 }
 0xbc9   :  { %4805 = vmatpush3.msra.mxu0 %v5735_v27 }
 0xbca   :  { %4801 = vmatprep.mubr.msk.f32.mxu1 %vm203_vm1, %v5742_v5  ;;  %4806 = vmatprep.subr.mxu0 %v5742_v5 }
 0xbcb   :  { %4802 = vmatmul.mubr.msk.f32.gmra.mxu1 %vm203_vm1, %v5735_v27  ;;  %4807 = vmatpush3.msra.mxu0 %v5742_v5 }
 0xbcc   :  { %4808 = vmatprep.subr.mxu0 %v5732_v25  ;;  %4848 = vmatprep.mubr.msk.f32.mxu1 %vm84_vm0, %v5298_v40 }
 0xbcd   :  { %4809 = vmatpush3.msra.mxu0 %v5732_v25 }
 0xbce   :  { %4810 = vmatprep.subr.mxu0 %v5729_v60 }
 0xbcf   :  { %4811 = vmatpush3.msra.mxu0 %v5729_v60 }
 0xbd0   :  { %4813 = vmatmul.mubr.msk.f32.vlgmr.msra.gmra.mxu0 %vm84_vm0, %v5313_v42  ;;  %4818 = vmatprep.subr.mxu0 %v2617_v6 }
 0xbd1   :  { %4815 = vmatprep.mubr.msk.f32.mxu0 %vm84_vm0, %v5317_v43  ;;  %4819 = vmatpush3.msra.mxu0 %v2617_v6 }
 0xbd2   :  { %4820 = vmatprep.subr.mxu0 %v2616_v58 }
 0xbd3   :  { %4821 = vmatpush3.msra.mxu0 %v2616_v58 }
 0xbd4   :  { %4816 = vmatmul.mubr.msk.f32.gmra.mxu0 %vm84_vm0, %v5323_v44  ;;  %4822 = vmatprep.subr.mxu0 %v2615_v61 }
 0xbd5   :  { %4823 = vmatpush3.msra.mxu0 %v2615_v61  ;;  %v4049_v61 = vld [vmem:[%s6019_s5 + $0x1] ss:$0 sm:$0xff] }
 0xbd6   :  { %4824 = vmatprep.subr.mxu0 %v2614_v9 }
 0xbd7   :  { %4825 = vmatpush3.msra.mxu0 %v2614_v9  ;;  %v2313_v9 = vadd.f32 %v5764_v17, %v5726_v3 }
 0xbd8   :  { %4826 = vmatprep.subr.mxu0 %v2613_v46 }
 0xbd9   :  { %4827 = vmatpush3.msra.mxu0 %v2613_v46 }
 0xbda   :  { %4828 = vmatprep.subr.mxu0 %v2612_v10 }
 0xbdb   :  { %4829 = vmatpush3.msra.mxu0 %v2612_v10 }
 0xbdc   :  { %4830 = vmatprep.subr.mxu0 %v2611_v11 }
 0xbdd   :  { %4831 = vmatpush3.msra.mxu0 %v2611_v11 }
 0xbde   :  { %4832 = vmatprep.subr.mxu0 %v2610_v12 }
 0xbdf   :  { %4833 = vmatpush3.msra.mxu0 %v2610_v12 }
 0xc87   :  { %v4800_v20 = vpop.f32.mrf.mxu1 }
 0xc88   :  { %v5766_v48 = vadd.f32 %v4800_v20, %v2308_v19 }
 0xc89   :  { %v2497_v16 = vpop.f32.mrf.mxu1 }
 0xc8a   :  { %v5768_v8 = vadd.f32 %v2497_v16, %v2303_v21 }
 0xc8b   :  { %v4803_v63 = vpop.f32.mrf.mxu1 }
 0xc8c   :  { %v5770_v59 = vadd.f32 %v4803_v63, %v2318_v22 }
 0xc8d   :  { %v2507_v53 = vpop.f32.mrf.mxu1 }
 0xc8e   :  { %v2518_v11 = vadd.f32 %v2507_v53, %v2313_v9 }
 0xc90   :  { %v4814_v28 = vpop.f32.mrf.mxu0 }
 0xc91   :  { %v2606_v32 = vsub.f32 %v4814_v28, %v5692_v38  ;;  %v2816_v38 = vld [vmem:[#allocation2 + $0x278] sm:$0xff] }
 0xc92   :  { %v2586_v29 = vpop.f32.mrf.mxu0 }
 0xc93   :  { %v2605_v31 = vsub.f32 %v2586_v29, %v5694_v39  ;;  %v2815_v39 = vld [vmem:[#allocation2 + $0x270] sm:$0xff] }
 0xc94   :  { %v4817_v33 = vpop.f32.mrf.mxu0 }
 0xc95   :  { %v2608_v34 = vsub.f32 %v4817_v33, %v5698_v41  ;;  %4834 = vmatprep.mubr.msk.f32.mxu0 %vm203_vm1, %v2605_v31  ;;  %v2814_v41 = vld [vmem:[#allocation2 + $0x268] sm:$0xff] }
 0xc96   :  { %v2596_v35 = vpop.f32.mrf.mxu0  ;;  %4835 = vmatmul.mubr.msk.f32.vlgmr.msra.gmra.mxu0 %vm203_vm1, %v2606_v32 }
 0xc97   :  { %v2607_v55 = vsub.f32 %v2596_v35, %v5703_v49  ;;  %4840 = vmatprep.subr.mxu1 %v2608_v34  ;;  %v2813_v49 = vld [vmem:[#allocation2 + $0x260] sm:$0xff] }
 0xc98   :  { %4841 = vmatpush3.msra.mxu1 %v2608_v34 }
 0xc99   :  { %4837 = vmatprep.mubr.msk.f32.mxu0 %vm203_vm1, %v2607_v55  ;;  %4842 = vmatprep.subr.mxu1 %v2607_v55 }
 0xc9a   :  { %4838 = vmatmul.mubr.msk.f32.gmra.mxu0 %vm203_vm1, %v2608_v34  ;;  %4843 = vmatpush3.msra.mxu1 %v2607_v55  ;;  %v2978_v55 = vld [vmem:[#allocation5 + $0xb8] sm:$0xff] }
 0xc9b   :  { %4844 = vmatprep.subr.mxu1 %v2606_v32  ;;  %4884 = vmatprep.mubr.msk.f32.mxu0 %vm84_vm0, %v5065_v36 }
 0xc9c   :  { %4845 = vmatpush3.msra.mxu1 %v2606_v32 }
 0xc9d   :  { %4846 = vmatprep.subr.mxu1 %v2605_v31 }
 0xc9e   :  { %4847 = vmatpush3.msra.mxu1 %v2605_v31 }
 0xc9f   :  { %4849 = vmatmul.mubr.msk.f32.vlgmr.msra.gmra.mxu1 %vm84_vm0, %v5313_v42  ;;  %4854 = vmatprep.subr.mxu1 %v2816_v38 }
 0xca0   :  { %4851 = vmatprep.mubr.msk.f32.mxu1 %vm84_vm0, %v5317_v43  ;;  %4855 = vmatpush3.msra.mxu1 %v2816_v38  ;;  %v2977_v38 = vld [vmem:[#allocation5 + $0xb0] sm:$0xff] }
 0xca1   :  { %4856 = vmatprep.subr.mxu1 %v2815_v39 }
 0xca2   :  { %4857 = vmatpush3.msra.mxu1 %v2815_v39  ;;  %v2976_v39 = vld [vmem:[#allocation5 + $0xa8] sm:$0xff] }
 0xca3   :  { %4852 = vmatmul.mubr.msk.f32.gmra.mxu1 %vm84_vm0, %v5323_v44  ;;  %4858 = vmatprep.subr.mxu1 %v2814_v41 }
 0xca4   :  { %4859 = vmatpush3.msra.mxu1 %v2814_v41  ;;  %v2975_v41 = vld [vmem:[#allocation5 + $0xa0] sm:$0xff] }
 0xca5   :  { %4860 = vmatprep.subr.mxu1 %v2813_v49 }
 0xca6   :  { %4861 = vmatpush3.msra.mxu1 %v2813_v49 }
 0xca7   :  { %4862 = vmatprep.subr.mxu1 %v2812_v50 }
 0xca8   :  { %4863 = vmatpush3.msra.mxu1 %v2812_v50 }
 0xca9   :  { %4864 = vmatprep.subr.mxu1 %v2811_v4 }
 0xcaa   :  { %4865 = vmatpush3.msra.mxu1 %v2811_v4 }
 0xcab   :  { %4866 = vmatprep.subr.mxu1 %v2810_v51 }
 0xcac   :  { %4867 = vmatpush3.msra.mxu1 %v2810_v51 }
 0xcad   :  { %4868 = vmatprep.subr.mxu1 %v2809_v52 }
 0xcae   :  { %4869 = vmatpush3.msra.mxu1 %v2809_v52 }
 0xcaf   :  { %4904 = vmatprep.subr.mxu1 %v2978_v55 }
 0xd56   :  { %v4836_v62 = vpop.f32.mrf.mxu0 }
 0xd58   :  { %v2696_v6 = vpop.f32.mrf.mxu0 }
 0xd5a   :  { %v4839_v58 = vpop.f32.mrf.mxu0 }
 0xd5b   :  { %v2718_v12 = vadd.f32 %v4839_v58, %v5770_v59  ;;  %v3353_v58 = vld [vmem:[#allocation5 + $0xe0] sm:$0xff] }
 0xd5c   :  { %v2706_v46 = vpop.f32.mrf.mxu0 }
 0xd5d   :  { %v2717_v19 = vadd.f32 %v2706_v46, %v2518_v11 }
 0xd5f   :  { %v4850_v54 = vpop.f32.mrf.mxu1 }
 0xd60   :  { %v2805_v2 = vsub.f32 %v4850_v54, %v5732_v25 }
 0xd61   :  { %v2785_v56 = vpop.f32.mrf.mxu1 }
 0xd62   :  { %v2804_v0 = vsub.f32 %v2785_v56, %v5729_v60  ;;  %v2716_v60 = vadd.f32 %v4836_v62, %v5766_v48  ;;  %v3355_v62 = vld [vmem:[#allocation5 + $0xf0] sm:$0xff] }
 0xd63   :  { %v4853_v1 = vpop.f32.mrf.mxu1 }
 0xd64   :  { %4870 = vmatprep.mubr.msk.f32.mxu1 %vm203_vm1, %v2804_v0  ;;  %v2807_v45 = vsub.f32 %v4853_v1, %v5735_v27 }
 0xd65   :  { %v2795_v23 = vpop.f32.mrf.mxu1  ;;  %4871 = vmatmul.mubr.msk.f32.vlgmr.msra.gmra.mxu1 %vm203_vm1, %v2805_v2 }
 0xd66   :  { %v2806_v57 = vsub.f32 %v2795_v23, %v5742_v5  ;;  %v2715_v5 = vadd.f32 %v2696_v6, %v5768_v8  ;;  %4905 = vmatpush3.msra.mxu1 %v2978_v55  ;;  %v3354_v6 = vld [vmem:[#allocation5 + $0xe8] sm:$0xff] }
 0xd67   :  { %4906 = vmatprep.subr.mxu1 %v2977_v38 }
 0xd68   :  { %4873 = vmatprep.mubr.msk.f32.mxu1 %vm203_vm1, %v2806_v57  ;;  %4907 = vmatpush3.msra.mxu1 %v2977_v38 }
 0xd69   :  { %4874 = vmatmul.mubr.msk.f32.gmra.mxu1 %vm203_vm1, %v2807_v45  ;;  %4908 = vmatprep.subr.mxu1 %v2976_v39  ;;  %v3356_v45 = vld [vmem:[#allocation5 + $0xf8] sm:$0xff] }
 0xd6a   :  { %4909 = vmatpush3.msra.mxu1 %v2976_v39 }
 0xd6b   :  { %4910 = vmatprep.subr.mxu1 %v2975_v41 }
 0xd6c   :  { %4911 = vmatpush3.msra.mxu1 %v2975_v41 }
 0xd6d   :  { %4932 = vmatprep.subr.mxu1 %v3356_v45 }
 0xe25   :  { %v4872_v25 = vpop.f32.mrf.mxu1 }
 0xe26   :  { %v2915_v27 = vadd.f32 %v4872_v25, %v2716_v60 }
 0xe27   :  { %v2895_v10 = vpop.f32.mrf.mxu1 }
 0xe28   :  { %v5806_v14 = vadd.f32 %v4049_v61, %v2915_v27  ;;  %v2914_v47 = vadd.f32 %v2895_v10, %v2715_v5 }
 0xe29   :  { %v4875_v15 = vpop.f32.mrf.mxu1 }
 0xe2a   :  { %v5808_v20 = vadd.f32 %v4049_v61, %v2914_v47  ;;  %v2917_v21 = vadd.f32 %v4875_v15, %v2718_v12  ;;  %v4051_v48 = vmul.f32 -1.442695, %v5806_v14 }
 0xe2b   :  { %v2905_v16 = vpop.f32.mrf.mxu1 }
 0xe2c   :  { %v5811_v3 = vadd.f32 %v4049_v61, %v2917_v21  ;;  %v2916_v17 = vadd.f32 %v2905_v16, %v2717_v19  ;;  %v4050_v22 = vmul.f32 -1.442695, %v5808_v20  ;;  %5034 = vpow2.f32 %v4051_v48  ;;  %v3551_v19 = vld [vmem:[#allocation5 + $0x118] sm:$0xff]  ;;  %v3550_v21 = vld [vmem:[#allocation5 + $0x110] sm:$0xff]  ;;  %v3549_v48 = vld [vmem:[#allocation5 + $0x108] sm:$0xff] }
 0xe2d   :  { %v3548_v16 = vld [vmem:[#allocation5 + $0x100] sm:$0xff] }
 0xe2e   :  { %v4053_v8 = vmul.f32 -1.442695, %v5811_v3  ;;  %v5815_v63 = vadd.f32 %v4049_v61, %v2916_v17 }
 0xe30   :  { %5036 = vpow2.f32 %v4053_v8  ;;  %v4052_v59 = vmul.f32 -1.442695, %v5815_v63 }
 0xe31   :  { %5038 = vpow2.f32 %v4050_v22 }
 0xe32   :  { %5040 = vpow2.f32 %v4052_v59 }
 0xe39   :  { %v5035_v28 = vpop.eup %5034 }
 0xe3a   :  { %v2943_v34 = vadd.f32 1.0, %v5035_v28 }
 0xe3d   :  { %v5037_v29 = vpop.eup %5036 }
 0xe3e   :  { %v5039_v31 = vpop.eup %5038  ;;  %v2945_v32 = vadd.f32 1.0, %v5037_v29 }
 0xe3f   :  { %v5041_v33 = vpop.eup %5040  ;;  %v2942_v36 = vadd.f32 1.0, %v5039_v31 }
 0xe40   :  { %5042 = vrcp.f32 %v2945_v32  ;;  %v2944_v35 = vadd.f32 1.0, %v5041_v33  ;;  %v3746_v32 = vld [vmem:[#allocation5 + $0x138] sm:$0xff]  ;;  %v3745_v33 = vld [vmem:[#allocation5 + $0x130] sm:$0xff] }
 0xe42   :  { %5044 = vrcp.f32 %v2944_v35  ;;  %v3743_v35 = vld [vmem:[#allocation5 + $0x120] sm:$0xff] }
 0xe43   :  { %5046 = vrcp.f32 %v2943_v34  ;;  %v3744_v34 = vld [vmem:[#allocation5 + $0x128] sm:$0xff] }
 0xe44   :  { %5048 = vrcp.f32 %v2942_v36 }
 0xe4d   :  { %v5818_v49 = vpop.eup %5042 }
 0xe4e   :  { %2964 = vrot.lane.b32.xlu0 %v5818_v49, %s5141_s10 }
 0xe4f   :  { %v5822_v50 = vpop.eup %5044 }
 0xe50   :  { %2962 = vrot.lane.b32.xlu1 %v5822_v50, %s5141_s10  ;;  %v5826_v4 = vpop.eup %5046 }
 0xe51   :  { %v5830_v51 = vpop.eup %5048 }
 0xe52   :  { %2960 = vrot.lane.b32.xlu0 %v5826_v4, %s5141_s10 }
 0xe54   :  { %2958 = vrot.lane.b32.xlu1 %v5830_v51, %s5141_s10 }
 0xec0   :  { %v2965_v52 = vpop.permute.xlu0 %2964 }
 0xec1   :  { %v5835_v53 = vmul.f32 %v5593_v26, %v2965_v52 }
 0xec2   :  { %v2963_v54 = vpop.permute.xlu1 %2962 }
 0xec3   :  { %v5838_v56 = vmul.f32 %v5599_v13, %v2963_v54  ;;  %4876 = vmatprep.subr.mxu0 %v5835_v53  ;;  %v3068_v13 = vld [vmem:[#allocation5 + $0xd8] sm:$0xff] }
 0xec4   :  { %4877 = vmatpush3.msra.mxu0 %v5835_v53  ;;  %v2961_v0 = vpop.permute.xlu0 %2960 }
 0xec5   :  { %v5843_v2 = vmul.f32 %v5606_v18, %v2961_v0  ;;  %4878 = vmatprep.subr.mxu0 %v5838_v56  ;;  %v3067_v18 = vld [vmem:[#allocation5 + $0xd0] sm:$0xff] }
 0xec6   :  { %4879 = vmatpush3.msra.mxu0 %v5838_v56  ;;  %v2959_v1 = vpop.permute.xlu1 %2958 }
 0xec7   :  { %v5848_v26 = vmul.f32 %v5613_v37, %v2959_v1  ;;  %4880 = vmatprep.subr.mxu0 %v5843_v2  ;;  %v3066_v37 = vld [vmem:[#allocation5 + $0xc8] sm:$0xff] }
 0xec8   :  { %4881 = vmatpush3.msra.mxu0 %v5843_v2 }
 0xec9   :  { %4882 = vmatprep.subr.mxu0 %v5848_v26  ;;  %4912 = vmatprep.mubr.msk.f32.mxu1 %vm84_vm0, %v5848_v26 }
 0xeca   :  { %4883 = vmatpush3.msra.mxu0 %v5848_v26  ;;  %4913 = vmatmul.mubr.msk.f32.vlgmr.msra.gmra.mxu1 %vm84_vm0, %v5843_v2 }
 0xecb   :  { %4885 = vmatmul.mubr.msk.f32.vlgmr.msra.gmra.mxu0 %vm84_vm0, %v5666_v7  ;;  %4915 = vmatprep.mubr.msk.f32.mxu1 %vm84_vm0, %v5838_v56  ;;  %v3065_v7 = vld [vmem:[#allocation5 + $0xc0] sm:$0xff] }
 0xecc   :  { %4887 = vmatprep.mubr.msk.f32.mxu0 %vm84_vm0, %v5673_v24  ;;  %4890 = vmatprep.subr.mxu0 %v3068_v13 }
 0xecd   :  { %4891 = vmatpush3.msra.mxu0 %v3068_v13  ;;  %4933 = vmatpush3.msra.mxu1 %v3356_v45 }
 0xece   :  { %4916 = vmatmul.mubr.msk.f32.gmra.mxu1 %vm84_vm0, %v5835_v53  ;;  %4892 = vmatprep.subr.mxu0 %v3067_v18 }
 0xecf   :  { %4888 = vmatmul.mubr.msk.f32.gmra.mxu0 %vm84_vm0, %v5680_v30  ;;  %4934 = vmatprep.subr.mxu1 %v3355_v62 }
 0xed0   :  { %4893 = vmatpush3.msra.mxu0 %v3067_v18  ;;  %4935 = vmatpush3.msra.mxu1 %v3355_v62 }
 0xed1   :  { %4894 = vmatprep.subr.mxu0 %v3066_v37  ;;  %4936 = vmatprep.subr.mxu1 %v3354_v6 }
 0xed2   :  { %4895 = vmatpush3.msra.mxu0 %v3066_v37  ;;  %4937 = vmatpush3.msra.mxu1 %v3354_v6 }
 0xed3   :  { %4896 = vmatprep.subr.mxu0 %v3065_v7  ;;  %4938 = vmatprep.subr.mxu1 %v3353_v58 }
 0xed4   :  { %4897 = vmatpush3.msra.mxu0 %v3065_v7  ;;  %4939 = vmatpush3.msra.mxu1 %v3353_v58 }
 0xed5   :  { %4960 = vmatprep.subr.mxu1 %v3551_v19 }
 0xf8a   :  { %v4914_v52 = vpop.f32.mrf.mxu1 }
 0xf8b   :  { %v5868_v23 = vpop.f32.mrf.mxu0 }
 0xf8d   :  { %v5870_v57 = vpop.f32.mrf.mxu0 }
 0xf8e   :  { %4898 = vmatprep.mubr.msk.f32.mxu0 %vm84_vm0, %v5870_v57 }
 0xf8f   :  { %v5874_v24 = vpop.f32.mrf.mxu0  ;;  %4899 = vmatmul.mubr.msk.f32.vlgmr.msra.gmra.mxu0 %vm84_vm0, %v5868_v23 }
 0xf90   :  { %4918 = vmatprep.subr.mxu0 %v5874_v24 }
 0xf91   :  { %v5879_v30 = vpop.f32.mrf.mxu0  ;;  %4919 = vmatpush3.msra.mxu0 %v5874_v24 }
 0xf92   :  { %4901 = vmatprep.mubr.msk.f32.mxu0 %vm84_vm0, %v5879_v30  ;;  %4920 = vmatprep.subr.mxu0 %v5879_v30 }
 0xf93   :  { %4902 = vmatmul.mubr.msk.f32.gmra.mxu0 %vm84_vm0, %v5874_v24 }
 0xf94   :  { %4921 = vmatpush3.msra.mxu0 %v5879_v30  ;;  %4926 = vmatprep.mubr.msk.f32.mxu0 %vm84_vm0, %v5298_v40 }
 0xf95   :  { %4922 = vmatprep.subr.mxu0 %v5868_v23 }
 0xf96   :  { %4923 = vmatpush3.msra.mxu0 %v5868_v23 }
 0xf97   :  { %4924 = vmatprep.subr.mxu0 %v5870_v57 }
 0xf98   :  { %4925 = vmatpush3.msra.mxu0 %v5870_v57 }
 0xf99   :  { %4927 = vmatmul.mubr.msk.f32.vlgmr.msra.gmra.mxu0 %vm84_vm0, %v5313_v42 }
 0xf9a   :  { %4929 = vmatprep.mubr.msk.f32.mxu0 %vm84_vm0, %v5317_v43 }
 0xf9d   :  { %4930 = vmatmul.mubr.msk.f32.gmra.mxu0 %vm84_vm0, %v5323_v44 }
 0xf9e   :  { %4954 = vmatprep.mubr.msk.f32.mxu0 %vm84_vm0, %v5298_v40 }
0x104f   :  { %v5902_v60 = vpop.f32.mrf.mxu0 }
0x1050   :  { %v3250_v7 = vadd.f32 %v4914_v52, %v5902_v60 }
0x1051   :  { %v5904_v25 = vpop.f32.mrf.mxu0 }
0x1053   :  { %v5906_v61 = vpop.f32.mrf.mxu0 }
0x1055   :  { %v5908_v9 = vpop.f32.mrf.mxu0 }
0x1059   :  { %v4928_v5 = vpop.f32.mrf.mxu0 }
0x105a   :  { %v5914_v10 = vsub.f32 %v4928_v5, %v5843_v2 }
0x105b   :  { %v3329_v27 = vpop.f32.mrf.mxu0 }
0x105c   :  { %v5911_v46 = vsub.f32 %v3329_v27, %v5848_v26 }
0x105d   :  { %v4931_v11 = vpop.f32.mrf.mxu0 }
0x105e   :  { %v5917_v12 = vsub.f32 %v4931_v11, %v5835_v53  ;;  %4940 = vmatprep.mubr.msk.f32.mxu1 %vm84_vm0, %v5911_v46  ;;  %v3244_v53 = vpop.f32.mrf.mxu1 }
0x105f   :  { %v3339_v47 = vpop.f32.mrf.mxu0  ;;  %4941 = vmatmul.mubr.msk.f32.vlgmr.msra.gmra.mxu1 %vm84_vm0, %v5914_v10 }
0x1060   :  { %v5924_v15 = vsub.f32 %v3339_v47, %v5838_v56  ;;  %4946 = vmatprep.subr.mxu0 %v5917_v12  ;;  %4961 = vmatpush3.msra.mxu1 %v3551_v19  ;;  %v4917_v54 = vpop.f32.mrf.mxu1 }
0x1061   :  { %4947 = vmatpush3.msra.mxu0 %v5917_v12  ;;  %4962 = vmatprep.subr.mxu1 %v3550_v21 }
0x1062   :  { %4943 = vmatprep.mubr.msk.f32.mxu1 %vm84_vm0, %v5924_v15  ;;  %4948 = vmatprep.subr.mxu0 %v5924_v15  ;;  %v3254_v56 = vpop.f32.mrf.mxu1 }
0x1063   :  { %4944 = vmatmul.mubr.msk.f32.gmra.mxu1 %vm84_vm0, %v5917_v12  ;;  %4949 = vmatpush3.msra.mxu0 %v5924_v15  ;;  %v3255_v58 = vadd.f32 %v3254_v56, %v5908_v9 }
0x1064   :  { %4950 = vmatprep.subr.mxu0 %v5914_v10  ;;  %4963 = vmatpush3.msra.mxu1 %v3550_v21 }
0x1065   :  { %4951 = vmatpush3.msra.mxu0 %v5914_v10  ;;  %4964 = vmatprep.subr.mxu1 %v3549_v48 }
0x1066   :  { %4952 = vmatprep.subr.mxu0 %v5911_v46  ;;  %4965 = vmatpush3.msra.mxu1 %v3549_v48 }
0x1067   :  { %4953 = vmatpush3.msra.mxu0 %v5911_v46  ;;  %4966 = vmatprep.subr.mxu1 %v3548_v16 }
0x1068   :  { %4955 = vmatmul.mubr.msk.f32.vlgmr.msra.gmra.mxu0 %vm84_vm0, %v5313_v42  ;;  %4967 = vmatpush3.msra.mxu1 %v3548_v16 }
0x1069   :  { %4957 = vmatprep.mubr.msk.f32.mxu0 %vm84_vm0, %v5317_v43  ;;  %4988 = vmatprep.subr.mxu1 %v3746_v32 }
0x106c   :  { %4958 = vmatmul.mubr.msk.f32.gmra.mxu0 %vm84_vm0, %v5323_v44 }
0x106d   :  { %4982 = vmatprep.mubr.msk.f32.mxu0 %vm84_vm0, %v5298_v40 }
0x111f   :  { %v4942_v0 = vpop.f32.mrf.mxu1 }
0x1121   :  { %v3435_v2 = vpop.f32.mrf.mxu1 }
0x1123   :  { %v4945_v1 = vpop.f32.mrf.mxu1 }
0x1125   :  { %v3445_v26 = vpop.f32.mrf.mxu1 }
0x1126   :  { %v3456_v11 = vadd.f32 %v3445_v26, %v3255_v58 }
0x1128   :  { %v4956_v17 = vpop.f32.mrf.mxu0 }
0x1129   :  { %v3544_v59 = vsub.f32 %v4956_v17, %v5868_v23  ;;  %v3245_v23 = vadd.f32 %v3244_v53, %v5904_v25  ;;  %v3878_v53 = vsub.f32 1.0, %v5822_v50 }
0x112a   :  { %v3524_v22 = vpop.f32.mrf.mxu0 }
0x112b   :  { %v3543_v8 = vsub.f32 %v3524_v22, %v5870_v57  ;;  %v3455_v57 = vadd.f32 %v4942_v0, %v3250_v7  ;;  %v3454_v45 = vadd.f32 %v3435_v2, %v3245_v23  ;;  %v5069_v0 = vld [vmem:[%s6016_s2 + $0x30] sm:$0xff] }
0x112c   :  { %v4959_v28 = vpop.f32.mrf.mxu0  ;;  %v3874_v2 = vmul.f32 %v5069_v0, %v5822_v50 }
0x112d   :  { %v3546_v40 = vsub.f32 %v4959_v28, %v5874_v24  ;;  %4968 = vmatprep.mubr.msk.f32.mxu1 %vm84_vm0, %v3543_v8 }
0x112e   :  { %v3534_v29 = vpop.f32.mrf.mxu0  ;;  %4969 = vmatmul.mubr.msk.f32.vlgmr.msra.gmra.mxu1 %vm84_vm0, %v3544_v59 }
0x112f   :  { %v3545_v31 = vsub.f32 %v3534_v29, %v5879_v30  ;;  %4974 = vmatprep.subr.mxu0 %v3546_v40  ;;  %4989 = vmatpush3.msra.mxu1 %v3746_v32  ;;  %v3260_v30 = vadd.f32 %v4917_v54, %v5906_v61 }
0x1130   :  { %4975 = vmatpush3.msra.mxu0 %v3546_v40  ;;  %4990 = vmatprep.subr.mxu1 %v3745_v33 }
0x1131   :  { %4971 = vmatprep.mubr.msk.f32.mxu1 %vm84_vm0, %v3545_v31  ;;  %4976 = vmatprep.subr.mxu0 %v3545_v31  ;;  %v3457_v5 = vadd.f32 %v4945_v1, %v3260_v30 }
0x1132   :  { %4972 = vmatmul.mubr.msk.f32.gmra.mxu1 %vm84_vm0, %v3546_v40  ;;  %4977 = vmatpush3.msra.mxu0 %v3545_v31 }
0x1133   :  { %4978 = vmatprep.subr.mxu0 %v3544_v59  ;;  %4991 = vmatpush3.msra.mxu1 %v3745_v33  ;;  %v3876_v33 = vsub.f32 1.0, %v5830_v51 }
0x1134   :  { %4979 = vmatpush3.msra.mxu0 %v3544_v59  ;;  %4992 = vmatprep.subr.mxu1 %v3744_v34 }
0x1135   :  { %4980 = vmatprep.subr.mxu0 %v3543_v8  ;;  %4993 = vmatpush3.msra.mxu1 %v3744_v34 }
0x1136   :  { %4981 = vmatpush3.msra.mxu0 %v3543_v8  ;;  %4994 = vmatprep.subr.mxu1 %v3743_v35 }
0x1137   :  { %4983 = vmatmul.mubr.msk.f32.vlgmr.msra.gmra.mxu0 %vm84_vm0, %v5313_v42  ;;  %4995 = vmatpush3.msra.mxu1 %v3743_v35 }
0x1138   :  { %4985 = vmatprep.mubr.msk.f32.mxu0 %vm84_vm0, %v5317_v43 }
0x113b   :  { %4986 = vmatmul.mubr.msk.f32.gmra.mxu0 %vm84_vm0, %v5323_v44 }
0x11ee   :  { %v4970_v13 = vpop.f32.mrf.mxu1 }
0x11ef   :  { %v3650_v62 = vadd.f32 %v4970_v13, %v3455_v57 }
0x11f0   :  { %v3630_v18 = vpop.f32.mrf.mxu1 }
0x11f1   :  { %v3649_v27 = vadd.f32 %v3630_v18, %v3454_v45 }
0x11f2   :  { %v4973_v37 = vpop.f32.mrf.mxu1 }
0x11f4   :  { %v3640_v24 = vpop.f32.mrf.mxu1 }
0x11f5   :  { %v3651_v25 = vadd.f32 %v3640_v24, %v3456_v11 }
0x11f7   :  { %v4984_v55 = vpop.f32.mrf.mxu0 }
0x11f8   :  { %v3739_v43 = vsub.f32 %v4984_v55, %v5914_v10  ;;  %v5067_v55 = vld [vmem:[%s6016_s2 + $0x20] sm:$0xff] }
0x11f9   :  { %v3719_v42 = vpop.f32.mrf.mxu0 }
0x11fa   :  { %v3738_v36 = vsub.f32 %v3719_v42, %v5911_v46  ;;  %v3872_v42 = vmul.f32 %v5067_v55, %v5830_v51 }
0x11fb   :  { %v4987_v38 = vpop.f32.mrf.mxu0 }
0x11fc   :  { %4996 = vmatprep.mubr.msk.f32.mxu1 %vm84_vm0, %v3738_v36  ;;  %v3741_v41 = vsub.f32 %v4987_v38, %v5917_v12  ;;  %v3652_v12 = vadd.f32 %v4973_v37, %v3457_v5  ;;  %v5068_v38 = vld [vmem:[%s6016_s2 + $0x38] sm:$0xff] }
0x11fd   :  { %v3729_v44 = vpop.f32.mrf.mxu0  ;;  %4997 = vmatmul.mubr.msk.f32.vlgmr.msra.gmra.mxu1 %vm84_vm0, %v3739_v43  ;;  %v3879_v43 = vsub.f32 1.0, %v5818_v49 }
0x11fe   :  { %v3740_v39 = vsub.f32 %v3729_v44, %v5924_v15 }
0x1200   :  { %4999 = vmatprep.mubr.msk.f32.mxu1 %vm84_vm0, %v3740_v39 }
0x1201   :  { %5000 = vmatmul.mubr.msk.f32.gmra.mxu1 %vm84_vm0, %v3741_v41 }
0x12bd   :  { %v4998_v6 = vpop.f32.mrf.mxu1 }
0x12be   :  { %v3845_v46 = vadd.f32 %v4998_v6, %v3650_v62 }
0x12bf   :  { %v3825_v10 = vpop.f32.mrf.mxu1 }
0x12c0   :  { %v3844_v47 = vadd.f32 %v3825_v10, %v3649_v27  ;;  %3854 = vrot.lane.b32.xlu1 %v3845_v46, %s5142_s11 }
0x12c1   :  { %v5001_v60 = vpop.f32.mrf.mxu1 }
0x12c2   :  { %v3847_v15 = vadd.f32 %v5001_v60, %v3652_v12  ;;  %3852 = vrot.lane.b32.xlu0 %v3844_v47, %s5142_s11 }
0x12c3   :  { %v3835_v61 = vpop.f32.mrf.mxu1 }
0x12c4   :  { %v3846_v19 = vadd.f32 %v3835_v61, %v3651_v25  ;;  %3858 = vrot.lane.b32.xlu1 %v3847_v15, %s5142_s11 }
0x12c6   :  { %3856 = vrot.lane.b32.xlu0 %v3846_v19, %s5142_s11 }
0x1332   :  { %v3855_v9 = vpop.permute.xlu1 %3854 }
0x1333   :  { %v3865_v21 = vadd.f32 %v3855_v9, %v5806_v14 }
0x1334   :  { %v3853_v48 = vpop.permute.xlu0 %3852 }
0x1335   :  { %5050 = vtanh.f32 %v3865_v21  ;;  %v3864_v16 = vadd.f32 %v3853_v48, %v5808_v20  ;;  %v3877_v20 = vsub.f32 1.0, %v5826_v4 }
0x1336   :  { %v3859_v17 = vpop.permute.xlu1 %3858 }
0x1337   :  { %5052 = vtanh.f32 %v3864_v16  ;;  %v3867_v22 = vadd.f32 %v3859_v17, %v5811_v3 }
0x1338   :  { %v3857_v8 = vpop.permute.xlu0 %3856 }
0x1339   :  { %5054 = vtanh.f32 %v3867_v22  ;;  %v3866_v59 = vadd.f32 %v3857_v8, %v5815_v63  ;;  %v5066_v63 = vld [vmem:[%s6016_s2 + $0x28] sm:$0xff] }
0x133a   :  { %v3873_v31 = vmul.f32 %v5066_v63, %v5826_v4  ;;  %v3875_v4 = vmul.f32 %v5068_v38, %v5818_v49 }
0x133b   :  { %5056 = vtanh.f32 %v3866_v59 }
0x1342   :  { %v5051_v28 = vpop.eup %5050 }
0x1343   :  { %3886 = vrot.lane.b32.xlu1 %v5051_v28, %s5142_s11 }
0x1344   :  { %v5053_v40 = vpop.eup %5052 }
0x1345   :  { %3884 = vrot.lane.b32.xlu0 %v5053_v40, %s5142_s11 }
0x1346   :  { %v5055_v14 = vpop.eup %5054 }
0x1347   :  { %3890 = vrot.lane.b32.xlu1 %v5055_v14, %s5142_s11 }
0x1348   :  { %v5057_v29 = vpop.eup %5056 }
0x1349   :  { %3888 = vrot.lane.b32.xlu0 %v5057_v29, %s5142_s11 }
0x13b5   :  { %v3887_v3 = vpop.permute.xlu1 %3886 }
0x13b6   :  { %v3897_v32 = vmul.f32 %v3887_v3, %v3877_v20 }
0x13b7   :  { %v3885_v34 = vpop.permute.xlu0 %3884 }
0x13b8   :  { %v3901_v35 = vadd.f32 %v3897_v32, %v3873_v31  ;;  %v3896_v36 = vmul.f32 %v3885_v34, %v3876_v33 }
0x13b9   :  { %v3891_v44 = vpop.permute.xlu1 %3890 }
0x13ba   :  { %v3905_v39 = vmax.f32 %v3901_v35, 0.0  ;;  %v3900_v41 = vadd.f32 %v3896_v36, %v3872_v42  ;;  %v3899_v52 = vmul.f32 %v3891_v44, %v3879_v43 }
0x13bb   :  { %v3889_v54 = vpop.permute.xlu0 %3888 }
0x13bc   :  { %3910 = vst.msk [vmem:[#allocation7 + $0x28] sm:$0xff] %vm84_vm0, %v3905_v39  ;;  %v3904_v56 = vmax.f32 %v3900_v41, 0.0  ;;  %v3903_v51 = vadd.f32 %v3899_v52, %v3875_v4  ;;  %v3898_v1 = vmul.f32 %v3889_v54, %v3878_v53 }
0x13be   :  { %3909 = vst.msk [vmem:[#allocation7 + $0x20] sm:$0xff] %vm84_vm0, %v3904_v56  ;;  %v3907_v49 = vmax.f32 %v3903_v51, 0.0  ;;  %v3902_v26 = vadd.f32 %v3898_v1, %v3874_v2 }
0x13c0   :  { %3912 = vst.msk [vmem:[#allocation7 + $0x38] sm:$0xff] %vm84_vm0, %v3907_v49  ;;  %v3906_v13 = vmax.f32 %v3902_v26, 0.0 }
0x13c2   :  { %3911 = vst.msk [vmem:[#allocation7 + $0x30] sm:$0xff] %vm84_vm0, %v3906_v13 }
0x13c3   :  { %5121 = shalt.err (!%p5118_p0)
}
0x13c4   :  { %3924 = dma.vmem_to_hbm [thread:$0]  %s3919_s12, 1024, %s6020_s6, [#allocation4], %s5137_s24, %s5137_s24, %s5138_s25  }
0x13c5   :  { %5134 = dma.done.wait [#allocation4], 1024  }
0x13c6   :  { %5135 = vsyncadd [#allocation4], 4294966272 }
0x13c7   :  { %3928 = vsyncpa [#allocation3], 1 }
0x13c8   :  { %3929 = vsyncpa [#allocation6], 1 }
0x13c9   :  { %3930 = vsyncpa [#allocation4], 1 }

</bundles_post_ra>
